<compile_context>
chip_gen: v7x
topology: tpu7x:2x2x1
jax: 0.10.0
libtpu: 0.0.40
codegen_flags: <defaults>
</compile_context>

<pallas_src>
import math

import jax
import jax.numpy as jnp
from jax.experimental import pallas as pl
from jax.experimental.pallas import tpu as pltpu


# ------------------------------------------------------------------ math helpers

def _layernorm(x, gamma, beta, eps=1e-5):
    mu = jnp.mean(x, axis=-1, keepdims=True)
    var = jnp.mean((x - mu) ** 2, axis=-1, keepdims=True)
    return (x - mu) * jax.lax.rsqrt(var + eps) * gamma + beta


def _gelu(x):
    # exact (erf-based) GELU == torch.nn.GELU() default
    return 0.5 * x * (1.0 + jax.lax.erf(x * 0.7071067811865476))


# ------------------------------------------------------------------ fused kernel

def make_critic_kernel(n_heads, T, H):
    S = 2 * T
    D = H // n_heads
    f32 = jnp.float32
    bf16 = jnp.bfloat16

    def kernel(states_ref, temb_ref, araw_ref, bias_ref,
               es_w1, es_b1, es_lng, es_lnb, es_w2, es_b2,
               ea_lng, ea_lnb, ea_w2, ea_b2,
               eln_g, eln_b,
               wqkv_ref, bqkv_ref, wp_ref, bp_ref,
               ln1g_ref, ln1b_ref, ln2g_ref, ln2b_ref,
               wm1_ref, bm1_ref, wm2_ref, bm2_ref,
               hd_w1, hd_b1, hd_w2r, hd_b2,
               o_ref, h_scratch):
        layer = pl.program_id(1)

        # ---- first layer step: embeddings -> [states | actions] token slab ----
        @pl.when(layer == 0)
        def _():
            t_emb = temb_ref[...]                                          # (T, H) f32
            se = jnp.dot(states_ref[...].astype(bf16), es_w1[...],
                         preferred_element_type=f32) + es_b1[...]
            se = _gelu(_layernorm(se, es_lng[...], es_lnb[...]))
            se = jnp.dot(se.astype(bf16), es_w2[...],
                         preferred_element_type=f32) + es_b2[...]
            se = _layernorm(se + t_emb, eln_g[...], eln_b[...])            # (T, H)

            ae = _gelu(_layernorm(araw_ref[...], ea_lng[...], ea_lnb[...]))
            ae = jnp.dot(ae.astype(bf16), ea_w2[...],
                         preferred_element_type=f32) + ea_b2[...]
            ae = _layernorm(ae + t_emb, eln_g[...], eln_b[...])            # (T, H)

            # [states | actions] ordering; causal bias is permuted to match.
            h_scratch[0:T, :] = se
            h_scratch[T:S, :] = ae

        h = h_scratch[...]                                                 # (S, H) f32

        # ---- transformer block `layer` (weights streamed by the grid) ----
        xn = _layernorm(h, ln1g_ref[...], ln1b_ref[...])
        qkv = jnp.dot(xn.astype(bf16), wqkv_ref[...],
                      preferred_element_type=f32) + bqkv_ref[...]          # (S, 3H)
        bias = bias_ref[...]                                               # (S, S) additive

        attn = jnp.zeros((S, H), f32)
        for hh in range(n_heads):
            qh = qkv[:, hh * D:(hh + 1) * D].astype(bf16)                  # scale folded in
            kh = qkv[:, H + hh * D:H + (hh + 1) * D].astype(bf16)
            vh = qkv[:, 2 * H + hh * D:2 * H + (hh + 1) * D].astype(bf16)
            s = jnp.einsum('qd,kd->qk', qh, kh,
                           preferred_element_type=f32) + bias              # (S, S)
            s = s - jnp.max(s, axis=-1, keepdims=True)
            p = jnp.exp(s)
            p = p * pl.reciprocal(jnp.sum(p, axis=-1, keepdims=True), approx=True)
            att = jnp.dot(p.astype(bf16), vh, preferred_element_type=f32)  # (S, D)
            # accumulate att_h @ Wp_h (full H-lane output) -> no (n_heads,S,H) temp
            attn = attn + jnp.dot(att.astype(bf16),
                                  wp_ref[hh * D:(hh + 1) * D, :],
                                  preferred_element_type=f32)
        h = h + attn + bp_ref[...]

        xn = _layernorm(h, ln2g_ref[...], ln2b_ref[...])
        m = _gelu(jnp.dot(xn.astype(bf16), wm1_ref[...],
                          preferred_element_type=f32) + bm1_ref[...])
        h = h + jnp.dot(m.astype(bf16), wm2_ref[...],
                        preferred_element_type=f32) + bm2_ref[...]
        h_scratch[...] = h

        # ---- last layer step: value head on the last action token (row S-1) ----
        @pl.when(layer == pl.num_programs(1) - 1)
        def _():
            h_last = h[S - 1:S, :]                                         # (1, H)
            hv = _gelu(jnp.dot(h_last.astype(bf16), hd_w1[...],
                               preferred_element_type=f32) + hd_b1[...])
            val = jnp.sum(hv * hd_w2r[...], axis=-1, keepdims=True) + hd_b2[...]
            o_ref[...] = jnp.broadcast_to(val, (8, 128))                   # lane-dense pad

    return kernel


# ------------------------------------------------------------------ forward wrapper

def transformer_critic_forward(params, timesteps, states, actions, *, n_heads):
    B, T, state_dim = states.shape
    H = params["embed_timestep"].shape[-1]
    L = len(params["blocks"])
    S = 2 * T
    D = H // n_heads
    f32, bf16 = jnp.float32, jnp.bfloat16

    # ---- embedding-table gathers hoisted out of the kernel ----
    t_emb = jnp.take(params["embed_timestep"], timesteps.astype(jnp.int32), axis=0).astype(f32)
    a_raw = jnp.take(params["embed_action"]["table"], actions.astype(jnp.int32), axis=0).astype(f32)

    # ---- (S,S) additive causal bias for the [states | actions] token order ----
    idx = jnp.arange(S)
    orig_pos = jnp.where(idx < T, 2 * idx, 2 * (idx - T) + 1)   # original interleaved position
    causal_bias = jnp.where(orig_pos[:, None] >= orig_pos[None, :], 0.0, -1e30).astype(f32)

    # ---- stack per-layer weights on a leading layer axis (streamed by the grid) ----
    def stack(name):
        return jnp.stack([blk[name] for blk in params["blocks"]], axis=0)

    scale = 1.0 / math.sqrt(D)
    wqkv = jnp.concatenate([stack("wq") * scale, stack("wk"), stack("wv")], axis=-1).astype(bf16)
    bqkv = jnp.concatenate([stack("bq") * scale, stack("bk"), stack("bv")], axis=-1)[:, None, :].astype(f32)
    wp = stack("wp").astype(bf16)                                  # (L, H, H), rows head-major
    bp = stack("bp")[:, None, :].astype(f32)
    ln1g = stack("ln1_g")[:, None, :]
    ln1b = stack("ln1_b")[:, None, :]
    ln2g = stack("ln2_g")[:, None, :]
    ln2b = stack("ln2_b")[:, None, :]
    wm1 = stack("wm1").astype(bf16)
    bm1 = stack("bm1")[:, None, :].astype(f32)
    wm2 = stack("wm2").astype(bf16)
    bm2 = stack("bm2")[:, None, :].astype(f32)

    es, ea, hd = params["embed_state"], params["embed_action"], params["head"]
    r2 = lambda v: v.reshape(1, -1).astype(f32)

    inputs, in_specs, kinds = [], [], []

    def add(x, kind):
        nd = x.ndim
        if kind == "const":
            spec = pl.BlockSpec(tuple(x.shape), lambda b, l, nd=nd: (0,) * nd)
        elif kind == "batch":
            spec = pl.BlockSpec((None,) + tuple(x.shape[1:]),
                                lambda b, l, nd=nd: (b,) + (0,) * (nd - 1))
        else:  # "layer"
            spec = pl.BlockSpec((None,) + tuple(x.shape[1:]),
                                lambda b, l, nd=nd: (l,) + (0,) * (nd - 1))
        inputs.append(x)
        in_specs.append(spec)
        kinds.append(kind)

    add(states.astype(f32), "batch")
    add(t_emb, "batch")
    add(a_raw, "batch")
    add(causal_bias, "const")
    add(es["w1"].astype(bf16), "const"); add(r2(es["b1"]), "const")
    add(r2(es["ln_g"]), "const");        add(r2(es["ln_b"]), "const")
    add(es["w2"].astype(bf16), "const"); add(r2(es["b2"]), "const")
    add(r2(ea["ln_g"]), "const");        add(r2(ea["ln_b"]), "const")
    add(ea["w2"].astype(bf16), "const"); add(r2(ea["b2"]), "const")
    add(r2(params["embed_ln"]["g"]), "const")
    add(r2(params["embed_ln"]["b"]), "const")
    add(wqkv, "layer"); add(bqkv, "layer")
    add(wp, "layer");   add(bp, "layer")
    add(ln1g, "layer"); add(ln1b, "layer")
    add(ln2g, "layer"); add(ln2b, "layer")
    add(wm1, "layer");  add(bm1, "layer")
    add(wm2, "layer");  add(bm2, "layer")
    add(hd["w1"].astype(bf16), "const"); add(r2(hd["b1"]), "const")
    add(hd["w2"].reshape(1, H).astype(f32), "const")
    add(hd["b2"].reshape(1, 1).astype(f32), "const")

    # ---- scoped-VMEM budget: resident consts + double-buffered streamed blocks ----
    vmem_bytes = 0
    for x, kind in zip(inputs, kinds):
        blk_elems = int(x.size) if kind == "const" else int(x.size) // int(x.shape[0])
        vmem_bytes += (1 if kind == "const" else 2) * blk_elems * x.dtype.itemsize
    vmem_bytes += 2 * 8 * 128 * 4 + S * H * 4            # output block + h scratch
    vmem_limit = int(min(60 << 20, max(8 << 20, 2 * vmem_bytes)))   # headroom under v7x 64 MiB

    out = pl.pallas_call(
        make_critic_kernel(n_heads, T, H),
        out_shape=jax.ShapeDtypeStruct((B, 8, 128), f32),
        grid_spec=pltpu.PrefetchScalarGridSpec(
            num_scalar_prefetch=0,
            grid=(B, L),
            in_specs=in_specs,
            out_specs=pl.BlockSpec((None, 8, 128), lambda b, l: (b, 0, 0)),
            scratch_shapes=[pltpu.VMEM((S, H), f32)],
        ),
        compiler_params=pltpu.CompilerParams(
            dimension_semantics=("parallel", "arbitrary"),
            vmem_limit_bytes=vmem_limit,
        ),
    )(*inputs)
    return out[:, 0, :1]                                  # (B, 1), matches PyTorch output


# ------------------------------------------------------------------ parameters

def init_params(key, state_dim, act_dim, n_blocks, h_dim, max_timestep):
    H = h_dim
    keys = iter(jax.random.split(key, 128))

    def nrm(shape, scale=0.02):
        return scale * jax.random.normal(next(keys), shape, jnp.float32)

    def ones(shape):
        return jnp.ones(shape, jnp.float32)

    def zeros(shape):
        return jnp.zeros(shape, jnp.float32)

    blocks = []
    for _ in range(n_blocks):
        blocks.append({
            "wq": nrm((H, H)), "bq": zeros((H,)),
            "wk": nrm((H, H)), "bk": zeros((H,)),
            "wv": nrm((H, H)), "bv": zeros((H,)),
            "wp": nrm((H, H)), "bp": zeros((H,)),
            "ln1_g": ones((H,)), "ln1_b": zeros((H,)),
            "ln2_g": ones((H,)), "ln2_b": zeros((H,)),
            "wm1": nrm((H, 4 * H)), "bm1": zeros((4 * H,)),
            "wm2": nrm((4 * H, H)), "bm2": zeros((H,)),
        })

    return {
        "embed_timestep": nrm((max_timestep, H)),
        "embed_state": {
            "w1": nrm((state_dim, H)), "b1": zeros((H,)),
            "ln_g": ones((H,)), "ln_b": zeros((H,)),
            "w2": nrm((H, H)), "b2": zeros((H,)),
        },
        "embed_action": {
            "table": nrm((act_dim, H)),
            "ln_g": ones((H,)), "ln_b": zeros((H,)),
            "w2": nrm((H, H)), "b2": zeros((H,)),
        },
        "embed_ln": {"g": ones((H,)), "b": zeros((H,))},
        "blocks": blocks,
        "head": {"w1": nrm((H, H)), "b1": zeros((H,)),
                 "w2": nrm((H, 1)), "b2": zeros((1,))},
    }


# ------------------------------------------------------------------ main

if __name__ == "__main__":
    B = 2
    context_len = 8            # T  (token sequence length S = 2T = 16)
    state_dim = 8
    act_dim = 5
    h_dim = 32
    n_heads = 2
    n_blocks = 2
    max_timestep = 64

    root = jax.random.PRNGKey(0)
    pkey, k_s, k_a, k_t = jax.random.split(root, 4)

    params = init_params(pkey, state_dim, act_dim, n_blocks, h_dim, max_timestep)

    states = jax.random.normal(k_s, (B, context_len, state_dim), jnp.float32)
    actions = jax.random.randint(k_a, (B, context_len), 0, act_dim, jnp.int32)
    timesteps = jax.random.randint(k_t, (B, context_len), 0, max_timestep, jnp.int32)

    fwd = jax.jit(transformer_critic_forward, static_argnames=("n_heads",))
    out = fwd(params, timesteps, states, actions, n_heads=n_heads)
    out = jax.block_until_ready(out)
    assert out.shape == (B, 1) and out.dtype == jnp.float32
    assert bool(jnp.all(jnp.isfinite(out)))
    print("KERNEL_OK")
</pallas_src>

<mosaic_0001>
module attributes {stable_mosaic.version = 11 : i64} {
  func.func @kernel(%arg0: i32, %arg1: i32, %arg2: memref<1x8x8xf32, #tpu.memory_space<vmem>>, %arg3: memref<1x8x32xf32, #tpu.memory_space<vmem>>, %arg4: memref<1x8x32xf32, #tpu.memory_space<vmem>>, %arg5: memref<16x16xf32, #tpu.memory_space<vmem>>, %arg6: memref<8x32xbf16, #tpu.memory_space<vmem>>, %arg7: memref<1x32xf32, #tpu.memory_space<vmem>>, %arg8: memref<1x32xf32, #tpu.memory_space<vmem>>, %arg9: memref<1x32xf32, #tpu.memory_space<vmem>>, %arg10: memref<32x32xbf16, #tpu.memory_space<vmem>>, %arg11: memref<1x32xf32, #tpu.memory_space<vmem>>, %arg12: memref<1x32xf32, #tpu.memory_space<vmem>>, %arg13: memref<1x32xf32, #tpu.memory_space<vmem>>, %arg14: memref<32x32xbf16, #tpu.memory_space<vmem>>, %arg15: memref<1x32xf32, #tpu.memory_space<vmem>>, %arg16: memref<1x32xf32, #tpu.memory_space<vmem>>, %arg17: memref<1x32xf32, #tpu.memory_space<vmem>>, %arg18: memref<1x32x96xbf16, #tpu.memory_space<vmem>>, %arg19: memref<1x1x96xf32, #tpu.memory_space<vmem>>, %arg20: memref<1x32x32xbf16, #tpu.memory_space<vmem>>, %arg21: memref<1x1x32xf32, #tpu.memory_space<vmem>>, %arg22: memref<1x1x32xf32, #tpu.memory_space<vmem>>, %arg23: memref<1x1x32xf32, #tpu.memory_space<vmem>>, %arg24: memref<1x1x32xf32, #tpu.memory_space<vmem>>, %arg25: memref<1x1x32xf32, #tpu.memory_space<vmem>>, %arg26: memref<1x32x128xbf16, #tpu.memory_space<vmem>>, %arg27: memref<1x1x128xf32, #tpu.memory_space<vmem>>, %arg28: memref<1x128x32xbf16, #tpu.memory_space<vmem>>, %arg29: memref<1x1x32xf32, #tpu.memory_space<vmem>>, %arg30: memref<32x32xbf16, #tpu.memory_space<vmem>>, %arg31: memref<1x32xf32, #tpu.memory_space<vmem>>, %arg32: memref<1x32xf32, #tpu.memory_space<vmem>>, %arg33: memref<1x1xf32, #tpu.memory_space<vmem>>, %arg34: memref<1x8x128xf32, #tpu.memory_space<vmem>>, %arg35: memref<16x32xf32, #tpu.memory_space<vmem>>) attributes {dimension_semantics = [#tpu.dimension_semantics<parallel>, #tpu.dimension_semantics<arbitrary>], iteration_bounds = array<i64: 2, 2>, scalar_prefetch = 0 : i64, scratch_operands = 1 : i64, tpu.core_type = #tpu.core_type<tc>, window_params = [{transform_indices = @transform_0, window_bounds = array<i64: 1, 8, 8>}, {transform_indices = @transform_1, window_bounds = array<i64: 1, 8, 32>}, {transform_indices = @transform_2, window_bounds = array<i64: 1, 8, 32>}, {pipeline_mode = #tpu.pipeline_mode<synchronous>, transform_indices = @transform_3, window_bounds = array<i64: 16, 16>}, {pipeline_mode = #tpu.pipeline_mode<synchronous>, transform_indices = @transform_4, window_bounds = array<i64: 8, 32>}, {pipeline_mode = #tpu.pipeline_mode<synchronous>, transform_indices = @transform_5, window_bounds = array<i64: 1, 32>}, {pipeline_mode = #tpu.pipeline_mode<synchronous>, transform_indices = @transform_6, window_bounds = array<i64: 1, 32>}, {pipeline_mode = #tpu.pipeline_mode<synchronous>, transform_indices = @transform_7, window_bounds = array<i64: 1, 32>}, {pipeline_mode = #tpu.pipeline_mode<synchronous>, transform_indices = @transform_8, window_bounds = array<i64: 32, 32>}, {pipeline_mode = #tpu.pipeline_mode<synchronous>, transform_indices = @transform_9, window_bounds = array<i64: 1, 32>}, {pipeline_mode = #tpu.pipeline_mode<synchronous>, transform_indices = @transform_10, window_bounds = array<i64: 1, 32>}, {pipeline_mode = #tpu.pipeline_mode<synchronous>, transform_indices = @transform_11, window_bounds = array<i64: 1, 32>}, {pipeline_mode = #tpu.pipeline_mode<synchronous>, transform_indices = @transform_12, window_bounds = array<i64: 32, 32>}, {pipeline_mode = #tpu.pipeline_mode<synchronous>, transform_indices = @transform_13, window_bounds = array<i64: 1, 32>}, {pipeline_mode = #tpu.pipeline_mode<synchronous>, transform_indices = @transform_14, window_bounds = array<i64: 1, 32>}, {pipeline_mode = #tpu.pipeline_mode<synchronous>, transform_indices = @transform_15, window_bounds = array<i64: 1, 32>}, {transform_indices = @transform_16, window_bounds = array<i64: 1, 32, 96>}, {transform_indices = @transform_17, window_bounds = array<i64: 1, 1, 96>}, {transform_indices = @transform_18, window_bounds = array<i64: 1, 32, 32>}, {transform_indices = @transform_19, window_bounds = array<i64: 1, 1, 32>}, {transform_indices = @transform_20, window_bounds = array<i64: 1, 1, 32>}, {transform_indices = @transform_21, window_bounds = array<i64: 1, 1, 32>}, {transform_indices = @transform_22, window_bounds = array<i64: 1, 1, 32>}, {transform_indices = @transform_23, window_bounds = array<i64: 1, 1, 32>}, {transform_indices = @transform_24, window_bounds = array<i64: 1, 32, 128>}, {transform_indices = @transform_25, window_bounds = array<i64: 1, 1, 128>}, {transform_indices = @transform_26, window_bounds = array<i64: 1, 128, 32>}, {transform_indices = @transform_27, window_bounds = array<i64: 1, 1, 32>}, {pipeline_mode = #tpu.pipeline_mode<synchronous>, transform_indices = @transform_28, window_bounds = array<i64: 32, 32>}, {pipeline_mode = #tpu.pipeline_mode<synchronous>, transform_indices = @transform_29, window_bounds = array<i64: 1, 32>}, {pipeline_mode = #tpu.pipeline_mode<synchronous>, transform_indices = @transform_30, window_bounds = array<i64: 1, 32>}, {pipeline_mode = #tpu.pipeline_mode<synchronous>, transform_indices = @transform_31, window_bounds = array<i64: 1, 1>}, {transform_indices = @transform_32, window_bounds = array<i64: 1, 8, 128>}]} {
    %c0_i32 = arith.constant 0 : i32
    %0 = arith.cmpi eq, %arg1, %c0_i32 : i32
    %1 = arith.extui %0 : i1 to i32
    %c0_i32_0 = arith.constant 0 : i32
    %2 = arith.cmpi ne, %1, %c0_i32_0 : i32
    scf.if %2 {
      %c0_71 = arith.constant 0 : index
      %c0_72 = arith.constant 0 : index
      %c0_73 = arith.constant 0 : index
      %150 = vector.load %arg3[%c0_71, %c0_72, %c0_73] : memref<1x8x32xf32, #tpu.memory_space<vmem>>, vector<1x8x32xf32>
      %151 = vector.shape_cast %150 : vector<1x8x32xf32> to vector<8x32xf32>
      %c0_74 = arith.constant 0 : index
      %c0_75 = arith.constant 0 : index
      %c0_76 = arith.constant 0 : index
      %152 = vector.load %arg2[%c0_74, %c0_75, %c0_76] : memref<1x8x8xf32, #tpu.memory_space<vmem>>, vector<1x8x8xf32>
      %153 = vector.shape_cast %152 : vector<1x8x8xf32> to vector<8x8xf32>
      %154 = arith.truncf %153 : vector<8x8xf32> to vector<8x8xbf16>
      %c0_77 = arith.constant 0 : index
      %c0_78 = arith.constant 0 : index
      %155 = vector.load %arg6[%c0_77, %c0_78] : memref<8x32xbf16, #tpu.memory_space<vmem>>, vector<8x32xbf16>
      %cst_79 = arith.constant dense<0.000000e+00> : vector<8x32xf32>
      %156 = tpu.matmul %154, %155, %cst_79 {dimension_numbers = #tpu.dot_dimension_numbers<[1], [0], [0], [1], [0, 0, 1, 1], [], []>} : vector<8x8xbf16>, vector<8x32xbf16>, vector<8x32xf32> -> vector<8x32xf32>
      %c0_80 = arith.constant 0 : index
      %c0_81 = arith.constant 0 : index
      %157 = vector.load %arg7[%c0_80, %c0_81] : memref<1x32xf32, #tpu.memory_space<vmem>>, vector<1x32xf32>
      %158 = vector.broadcast %157 : vector<1x32xf32> to vector<8x32xf32>
      %159 = arith.addf %156, %158 : vector<8x32xf32>
      %c0_82 = arith.constant 0 : index
      %c0_83 = arith.constant 0 : index
      %160 = vector.load %arg8[%c0_82, %c0_83] : memref<1x32xf32, #tpu.memory_space<vmem>>, vector<1x32xf32>
      %c0_84 = arith.constant 0 : index
      %c0_85 = arith.constant 0 : index
      %161 = vector.load %arg9[%c0_84, %c0_85] : memref<1x32xf32, #tpu.memory_space<vmem>>, vector<1x32xf32>
      %cst_86 = arith.constant dense<0.000000e+00> : vector<8xf32>
      %162 = vector.multi_reduction <add>, %159, %cst_86 [1] : vector<8x32xf32> to vector<8xf32>
      %163 = vector.shape_cast %162 : vector<8xf32> to vector<8x1xf32>
      %cst_87 = arith.constant 3.200000e+01 : f32
      %164 = vector.broadcast %cst_87 : f32 to vector<8x1xf32>
      %165 = arith.divf %163, %164 : vector<8x1xf32>
      %166 = vector.broadcast %165 : vector<8x1xf32> to vector<8x32xf32>
      %167 = arith.subf %159, %166 : vector<8x32xf32>
      %168 = arith.mulf %167, %167 : vector<8x32xf32>
      %cst_88 = arith.constant dense<0.000000e+00> : vector<8xf32>
      %169 = vector.multi_reduction <add>, %168, %cst_88 [1] : vector<8x32xf32> to vector<8xf32>
      %170 = vector.shape_cast %169 : vector<8xf32> to vector<8x1xf32>
      %cst_89 = arith.constant 3.200000e+01 : f32
      %171 = vector.broadcast %cst_89 : f32 to vector<8x1xf32>
      %172 = arith.divf %170, %171 : vector<8x1xf32>
      %173 = vector.broadcast %165 : vector<8x1xf32> to vector<8x32xf32>
      %174 = arith.subf %159, %173 : vector<8x32xf32>
      %cst_90 = arith.constant 9.99999974E-6 : f32
      %175 = vector.broadcast %cst_90 : f32 to vector<8x1xf32>
      %176 = arith.addf %172, %175 : vector<8x1xf32>
      %177 = math.rsqrt %176 : vector<8x1xf32>
      %178 = vector.broadcast %177 : vector<8x1xf32> to vector<8x32xf32>
      %179 = arith.mulf %174, %178 : vector<8x32xf32>
      %180 = vector.broadcast %160 : vector<1x32xf32> to vector<8x32xf32>
      %181 = arith.mulf %179, %180 : vector<8x32xf32>
      %182 = vector.broadcast %161 : vector<1x32xf32> to vector<8x32xf32>
      %183 = arith.addf %181, %182 : vector<8x32xf32>
      %cst_91 = arith.constant 5.000000e-01 : f32
      %184 = vector.broadcast %cst_91 : f32 to vector<8x32xf32>
      %185 = arith.mulf %184, %183 : vector<8x32xf32>
      %cst_92 = arith.constant 0.707106769 : f32
      %186 = vector.broadcast %cst_92 : f32 to vector<8x32xf32>
      %187 = arith.mulf %183, %186 : vector<8x32xf32>
      %188 = math.erf %187 : vector<8x32xf32>
      %cst_93 = arith.constant 1.000000e+00 : f32
      %189 = vector.broadcast %cst_93 : f32 to vector<8x32xf32>
      %190 = arith.addf %189, %188 : vector<8x32xf32>
      %191 = arith.mulf %185, %190 : vector<8x32xf32>
      %192 = arith.truncf %191 : vector<8x32xf32> to vector<8x32xbf16>
      %c0_94 = arith.constant 0 : index
      %c0_95 = arith.constant 0 : index
      %193 = vector.load %arg10[%c0_94, %c0_95] : memref<32x32xbf16, #tpu.memory_space<vmem>>, vector<32x32xbf16>
      %cst_96 = arith.constant dense<0.000000e+00> : vector<8x32xf32>
      %194 = tpu.matmul %192, %193, %cst_96 {dimension_numbers = #tpu.dot_dimension_numbers<[1], [0], [0], [1], [0, 0, 1, 1], [], []>} : vector<8x32xbf16>, vector<32x32xbf16>, vector<8x32xf32> -> vector<8x32xf32>
      %c0_97 = arith.constant 0 : index
      %c0_98 = arith.constant 0 : index
      %195 = vector.load %arg11[%c0_97, %c0_98] : memref<1x32xf32, #tpu.memory_space<vmem>>, vector<1x32xf32>
      %196 = vector.broadcast %195 : vector<1x32xf32> to vector<8x32xf32>
      %197 = arith.addf %194, %196 : vector<8x32xf32>
      %198 = arith.addf %197, %151 : vector<8x32xf32>
      %c0_99 = arith.constant 0 : index
      %c0_100 = arith.constant 0 : index
      %199 = vector.load %arg16[%c0_99, %c0_100] : memref<1x32xf32, #tpu.memory_space<vmem>>, vector<1x32xf32>
      %c0_101 = arith.constant 0 : index
      %c0_102 = arith.constant 0 : index
      %200 = vector.load %arg17[%c0_101, %c0_102] : memref<1x32xf32, #tpu.memory_space<vmem>>, vector<1x32xf32>
      %cst_103 = arith.constant dense<0.000000e+00> : vector<8xf32>
      %201 = vector.multi_reduction <add>, %198, %cst_103 [1] : vector<8x32xf32> to vector<8xf32>
      %202 = vector.shape_cast %201 : vector<8xf32> to vector<8x1xf32>
      %cst_104 = arith.constant 3.200000e+01 : f32
      %203 = vector.broadcast %cst_104 : f32 to vector<8x1xf32>
      %204 = arith.divf %202, %203 : vector<8x1xf32>
      %205 = vector.broadcast %204 : vector<8x1xf32> to vector<8x32xf32>
      %206 = arith.subf %198, %205 : vector<8x32xf32>
      %207 = arith.mulf %206, %206 : vector<8x32xf32>
      %cst_105 = arith.constant dense<0.000000e+00> : vector<8xf32>
      %208 = vector.multi_reduction <add>, %207, %cst_105 [1] : vector<8x32xf32> to vector<8xf32>
      %209 = vector.shape_cast %208 : vector<8xf32> to vector<8x1xf32>
      %cst_106 = arith.constant 3.200000e+01 : f32
      %210 = vector.broadcast %cst_106 : f32 to vector<8x1xf32>
      %211 = arith.divf %209, %210 : vector<8x1xf32>
      %212 = vector.broadcast %204 : vector<8x1xf32> to vector<8x32xf32>
      %213 = arith.subf %198, %212 : vector<8x32xf32>
      %cst_107 = arith.constant 9.99999974E-6 : f32
      %214 = vector.broadcast %cst_107 : f32 to vector<8x1xf32>
      %215 = arith.addf %211, %214 : vector<8x1xf32>
      %216 = math.rsqrt %215 : vector<8x1xf32>
      %217 = vector.broadcast %216 : vector<8x1xf32> to vector<8x32xf32>
      %218 = arith.mulf %213, %217 : vector<8x32xf32>
      %219 = vector.broadcast %199 : vector<1x32xf32> to vector<8x32xf32>
      %220 = arith.mulf %218, %219 : vector<8x32xf32>
      %221 = vector.broadcast %200 : vector<1x32xf32> to vector<8x32xf32>
      %222 = arith.addf %220, %221 : vector<8x32xf32>
      %c0_108 = arith.constant 0 : index
      %c0_109 = arith.constant 0 : index
      %c0_110 = arith.constant 0 : index
      %223 = vector.load %arg4[%c0_108, %c0_109, %c0_110] : memref<1x8x32xf32, #tpu.memory_space<vmem>>, vector<1x8x32xf32>
      %224 = vector.shape_cast %223 : vector<1x8x32xf32> to vector<8x32xf32>
      %c0_111 = arith.constant 0 : index
      %c0_112 = arith.constant 0 : index
      %225 = vector.load %arg12[%c0_111, %c0_112] : memref<1x32xf32, #tpu.memory_space<vmem>>, vector<1x32xf32>
      %c0_113 = arith.constant 0 : index
      %c0_114 = arith.constant 0 : index
      %226 = vector.load %arg13[%c0_113, %c0_114] : memref<1x32xf32, #tpu.memory_space<vmem>>, vector<1x32xf32>
      %cst_115 = arith.constant dense<0.000000e+00> : vector<8xf32>
      %227 = vector.multi_reduction <add>, %224, %cst_115 [1] : vector<8x32xf32> to vector<8xf32>
      %228 = vector.shape_cast %227 : vector<8xf32> to vector<8x1xf32>
      %cst_116 = arith.constant 3.200000e+01 : f32
      %229 = vector.broadcast %cst_116 : f32 to vector<8x1xf32>
      %230 = arith.divf %228, %229 : vector<8x1xf32>
      %231 = vector.broadcast %230 : vector<8x1xf32> to vector<8x32xf32>
      %232 = arith.subf %224, %231 : vector<8x32xf32>
      %233 = arith.mulf %232, %232 : vector<8x32xf32>
      %cst_117 = arith.constant dense<0.000000e+00> : vector<8xf32>
      %234 = vector.multi_reduction <add>, %233, %cst_117 [1] : vector<8x32xf32> to vector<8xf32>
      %235 = vector.shape_cast %234 : vector<8xf32> to vector<8x1xf32>
      %cst_118 = arith.constant 3.200000e+01 : f32
      %236 = vector.broadcast %cst_118 : f32 to vector<8x1xf32>
      %237 = arith.divf %235, %236 : vector<8x1xf32>
      %238 = vector.broadcast %230 : vector<8x1xf32> to vector<8x32xf32>
      %239 = arith.subf %224, %238 : vector<8x32xf32>
      %cst_119 = arith.constant 9.99999974E-6 : f32
      %240 = vector.broadcast %cst_119 : f32 to vector<8x1xf32>
      %241 = arith.addf %237, %240 : vector<8x1xf32>
      %242 = math.rsqrt %241 : vector<8x1xf32>
      %243 = vector.broadcast %242 : vector<8x1xf32> to vector<8x32xf32>
      %244 = arith.mulf %239, %243 : vector<8x32xf32>
      %245 = vector.broadcast %225 : vector<1x32xf32> to vector<8x32xf32>
      %246 = arith.mulf %244, %245 : vector<8x32xf32>
      %247 = vector.broadcast %226 : vector<1x32xf32> to vector<8x32xf32>
      %248 = arith.addf %246, %247 : vector<8x32xf32>
      %cst_120 = arith.constant 5.000000e-01 : f32
      %249 = vector.broadcast %cst_120 : f32 to vector<8x32xf32>
      %250 = arith.mulf %249, %248 : vector<8x32xf32>
      %cst_121 = arith.constant 0.707106769 : f32
      %251 = vector.broadcast %cst_121 : f32 to vector<8x32xf32>
      %252 = arith.mulf %248, %251 : vector<8x32xf32>
      %253 = math.erf %252 : vector<8x32xf32>
      %cst_122 = arith.constant 1.000000e+00 : f32
      %254 = vector.broadcast %cst_122 : f32 to vector<8x32xf32>
      %255 = arith.addf %254, %253 : vector<8x32xf32>
      %256 = arith.mulf %250, %255 : vector<8x32xf32>
      %257 = arith.truncf %256 : vector<8x32xf32> to vector<8x32xbf16>
      %c0_123 = arith.constant 0 : index
      %c0_124 = arith.constant 0 : index
      %258 = vector.load %arg14[%c0_123, %c0_124] : memref<32x32xbf16, #tpu.memory_space<vmem>>, vector<32x32xbf16>
      %cst_125 = arith.constant dense<0.000000e+00> : vector<8x32xf32>
      %259 = tpu.matmul %257, %258, %cst_125 {dimension_numbers = #tpu.dot_dimension_numbers<[1], [0], [0], [1], [0, 0, 1, 1], [], []>} : vector<8x32xbf16>, vector<32x32xbf16>, vector<8x32xf32> -> vector<8x32xf32>
      %c0_126 = arith.constant 0 : index
      %c0_127 = arith.constant 0 : index
      %260 = vector.load %arg15[%c0_126, %c0_127] : memref<1x32xf32, #tpu.memory_space<vmem>>, vector<1x32xf32>
      %261 = vector.broadcast %260 : vector<1x32xf32> to vector<8x32xf32>
      %262 = arith.addf %259, %261 : vector<8x32xf32>
      %263 = arith.addf %262, %151 : vector<8x32xf32>
      %c0_128 = arith.constant 0 : index
      %c0_129 = arith.constant 0 : index
      %264 = vector.load %arg16[%c0_128, %c0_129] : memref<1x32xf32, #tpu.memory_space<vmem>>, vector<1x32xf32>
      %c0_130 = arith.constant 0 : index
      %c0_131 = arith.constant 0 : index
      %265 = vector.load %arg17[%c0_130, %c0_131] : memref<1x32xf32, #tpu.memory_space<vmem>>, vector<1x32xf32>
      %cst_132 = arith.constant dense<0.000000e+00> : vector<8xf32>
      %266 = vector.multi_reduction <add>, %263, %cst_132 [1] : vector<8x32xf32> to vector<8xf32>
      %267 = vector.shape_cast %266 : vector<8xf32> to vector<8x1xf32>
      %cst_133 = arith.constant 3.200000e+01 : f32
      %268 = vector.broadcast %cst_133 : f32 to vector<8x1xf32>
      %269 = arith.divf %267, %268 : vector<8x1xf32>
      %270 = vector.broadcast %269 : vector<8x1xf32> to vector<8x32xf32>
      %271 = arith.subf %263, %270 : vector<8x32xf32>
      %272 = arith.mulf %271, %271 : vector<8x32xf32>
      %cst_134 = arith.constant dense<0.000000e+00> : vector<8xf32>
      %273 = vector.multi_reduction <add>, %272, %cst_134 [1] : vector<8x32xf32> to vector<8xf32>
      %274 = vector.shape_cast %273 : vector<8xf32> to vector<8x1xf32>
      %cst_135 = arith.constant 3.200000e+01 : f32
      %275 = vector.broadcast %cst_135 : f32 to vector<8x1xf32>
      %276 = arith.divf %274, %275 : vector<8x1xf32>
      %277 = vector.broadcast %269 : vector<8x1xf32> to vector<8x32xf32>
      %278 = arith.subf %263, %277 : vector<8x32xf32>
      %cst_136 = arith.constant 9.99999974E-6 : f32
      %279 = vector.broadcast %cst_136 : f32 to vector<8x1xf32>
      %280 = arith.addf %276, %279 : vector<8x1xf32>
      %281 = math.rsqrt %280 : vector<8x1xf32>
      %282 = vector.broadcast %281 : vector<8x1xf32> to vector<8x32xf32>
      %283 = arith.mulf %278, %282 : vector<8x32xf32>
      %284 = vector.broadcast %264 : vector<1x32xf32> to vector<8x32xf32>
      %285 = arith.mulf %283, %284 : vector<8x32xf32>
      %286 = vector.broadcast %265 : vector<1x32xf32> to vector<8x32xf32>
      %287 = arith.addf %285, %286 : vector<8x32xf32>
      %c0_137 = arith.constant 0 : index
      %c0_138 = arith.constant 0 : index
      %288 = vector.load %arg35[%c0_137, %c0_138] : memref<16x32xf32, #tpu.memory_space<vmem>>, vector<8x32xf32>
      tpu.vector_store %arg35[%c0_137, %c0_138], %222 {strides = array<i32>} : memref<16x32xf32, #tpu.memory_space<vmem>>, vector<8x32xf32>,
      %c8 = arith.constant 8 : index
      %c0_139 = arith.constant 0 : index
      %289 = vector.load %arg35[%c8, %c0_139] : memref<16x32xf32, #tpu.memory_space<vmem>>, vector<8x32xf32>
      tpu.vector_store %arg35[%c8, %c0_139], %287 {strides = array<i32>} : memref<16x32xf32, #tpu.memory_space<vmem>>, vector<8x32xf32>,
    } else {
    }
    %c0 = arith.constant 0 : index
    %c0_1 = arith.constant 0 : index
    %3 = vector.load %arg35[%c0, %c0_1] : memref<16x32xf32, #tpu.memory_space<vmem>>, vector<16x32xf32>
    %c0_2 = arith.constant 0 : index
    %c0_3 = arith.constant 0 : index
    %c0_4 = arith.constant 0 : index
    %4 = vector.load %arg22[%c0_2, %c0_3, %c0_4] : memref<1x1x32xf32, #tpu.memory_space<vmem>>, vector<1x1x32xf32>
    %5 = vector.shape_cast %4 : vector<1x1x32xf32> to vector<1x32xf32>
    %c0_5 = arith.constant 0 : index
    %c0_6 = arith.constant 0 : index
    %c0_7 = arith.constant 0 : index
    %6 = vector.load %arg23[%c0_5, %c0_6, %c0_7] : memref<1x1x32xf32, #tpu.memory_space<vmem>>, vector<1x1x32xf32>
    %7 = vector.shape_cast %6 : vector<1x1x32xf32> to vector<1x32xf32>
    %cst = arith.constant dense<0.000000e+00> : vector<16xf32>
    %8 = vector.multi_reduction <add>, %3, %cst [1] : vector<16x32xf32> to vector<16xf32>
    %9 = vector.shape_cast %8 : vector<16xf32> to vector<16x1xf32>
    %cst_8 = arith.constant 3.200000e+01 : f32
    %10 = vector.broadcast %cst_8 : f32 to vector<16x1xf32>
    %11 = arith.divf %9, %10 : vector<16x1xf32>
    %12 = vector.broadcast %11 : vector<16x1xf32> to vector<16x32xf32>
    %13 = arith.subf %3, %12 : vector<16x32xf32>
    %14 = arith.mulf %13, %13 : vector<16x32xf32>
    %cst_9 = arith.constant dense<0.000000e+00> : vector<16xf32>
    %15 = vector.multi_reduction <add>, %14, %cst_9 [1] : vector<16x32xf32> to vector<16xf32>
    %16 = vector.shape_cast %15 : vector<16xf32> to vector<16x1xf32>
    %cst_10 = arith.constant 3.200000e+01 : f32
    %17 = vector.broadcast %cst_10 : f32 to vector<16x1xf32>
    %18 = arith.divf %16, %17 : vector<16x1xf32>
    %19 = vector.broadcast %11 : vector<16x1xf32> to vector<16x32xf32>
    %20 = arith.subf %3, %19 : vector<16x32xf32>
    %cst_11 = arith.constant 9.99999974E-6 : f32
    %21 = vector.broadcast %cst_11 : f32 to vector<16x1xf32>
    %22 = arith.addf %18, %21 : vector<16x1xf32>
    %23 = math.rsqrt %22 : vector<16x1xf32>
    %24 = vector.broadcast %23 : vector<16x1xf32> to vector<16x32xf32>
    %25 = arith.mulf %20, %24 : vector<16x32xf32>
    %26 = vector.broadcast %5 : vector<1x32xf32> to vector<16x32xf32>
    %27 = arith.mulf %25, %26 : vector<16x32xf32>
    %28 = vector.broadcast %7 : vector<1x32xf32> to vector<16x32xf32>
    %29 = arith.addf %27, %28 : vector<16x32xf32>
    %30 = arith.truncf %29 : vector<16x32xf32> to vector<16x32xbf16>
    %c0_12 = arith.constant 0 : index
    %c0_13 = arith.constant 0 : index
    %c0_14 = arith.constant 0 : index
    %31 = vector.load %arg18[%c0_12, %c0_13, %c0_14] : memref<1x32x96xbf16, #tpu.memory_space<vmem>>, vector<1x32x96xbf16>
    %32 = vector.shape_cast %31 : vector<1x32x96xbf16> to vector<32x96xbf16>
    %cst_15 = arith.constant dense<0.000000e+00> : vector<16x96xf32>
    %33 = tpu.matmul %30, %32, %cst_15 {dimension_numbers = #tpu.dot_dimension_numbers<[1], [0], [0], [1], [0, 0, 1, 1], [], []>} : vector<16x32xbf16>, vector<32x96xbf16>, vector<16x96xf32> -> vector<16x96xf32>
    %c0_16 = arith.constant 0 : index
    %c0_17 = arith.constant 0 : index
    %c0_18 = arith.constant 0 : index
    %34 = vector.load %arg19[%c0_16, %c0_17, %c0_18] : memref<1x1x96xf32, #tpu.memory_space<vmem>>, vector<1x1x96xf32>
    %35 = vector.shape_cast %34 : vector<1x1x96xf32> to vector<1x96xf32>
    %36 = vector.broadcast %35 : vector<1x96xf32> to vector<16x96xf32>
    %37 = arith.addf %33, %36 : vector<16x96xf32>
    %c0_19 = arith.constant 0 : index
    %c0_20 = arith.constant 0 : index
    %38 = vector.load %arg5[%c0_19, %c0_20] : memref<16x16xf32, #tpu.memory_space<vmem>>, vector<16x16xf32>
    %cst_21 = arith.constant 0.000000e+00 : f32
    %39 = vector.broadcast %cst_21 : f32 to vector<16x32xf32>
    %40 = vector.extract_strided_slice %37 {offsets = [0, 0], sizes = [16, 16], strides = [1, 1]} : vector<16x96xf32> to vector<16x16xf32>
    %41 = arith.truncf %40 : vector<16x16xf32> to vector<16x16xbf16>
    %42 = vector.extract_strided_slice %37 {offsets = [0, 32], sizes = [16, 16], strides = [1, 1]} : vector<16x96xf32> to vector<16x16xf32>
    %43 = arith.truncf %42 : vector<16x16xf32> to vector<16x16xbf16>
    %44 = vector.extract_strided_slice %37 {offsets = [0, 64], sizes = [16, 16], strides = [1, 1]} : vector<16x96xf32> to vector<16x16xf32>
    %45 = arith.truncf %44 : vector<16x16xf32> to vector<16x16xbf16>
    "tpu.trace_start"() <{level = 10 : i32, message = "qd,kd->qk"}> : () -> ()
    %cst_22 = arith.constant dense<0.000000e+00> : vector<16x16xf32>
    %46 = tpu.matmul %41, %43, %cst_22 {dimension_numbers = #tpu.dot_dimension_numbers<[1], [1], [0], [0], [0, 0, 1, 0], [], []>} : vector<16x16xbf16>, vector<16x16xbf16>, vector<16x16xf32> -> vector<16x16xf32>
    "tpu.trace_stop"() : () -> ()
    %47 = arith.addf %46, %38 : vector<16x16xf32>
    %cst_23 = arith.constant dense<0xFF800000> : vector<16xf32>
    %48 = vector.multi_reduction <maximumf>, %47, %cst_23 [1] : vector<16x16xf32> to vector<16xf32>
    %49 = vector.shape_cast %48 : vector<16xf32> to vector<16x1xf32>
    %50 = vector.broadcast %49 : vector<16x1xf32> to vector<16x16xf32>
    %51 = arith.subf %47, %50 : vector<16x16xf32>
    %52 = math.exp %51 : vector<16x16xf32>
    %cst_24 = arith.constant dense<0.000000e+00> : vector<16xf32>
    %53 = vector.multi_reduction <add>, %52, %cst_24 [1] : vector<16x16xf32> to vector<16xf32>
    %54 = vector.shape_cast %53 : vector<16xf32> to vector<16x1xf32>
    %55 = tpu.reciprocal %54 {approx = true} : vector<16x1xf32> -> vector<16x1xf32>
    %56 = vector.broadcast %55 : vector<16x1xf32> to vector<16x16xf32>
    %57 = arith.mulf %52, %56 : vector<16x16xf32>
    %58 = arith.truncf %57 : vector<16x16xf32> to vector<16x16xbf16>
    %cst_25 = arith.constant dense<0.000000e+00> : vector<16x16xf32>
    %59 = tpu.matmul %58, %45, %cst_25 {dimension_numbers = #tpu.dot_dimension_numbers<[1], [0], [0], [1], [0, 0, 1, 1], [], []>} : vector<16x16xbf16>, vector<16x16xbf16>, vector<16x16xf32> -> vector<16x16xf32>
    %60 = arith.truncf %59 : vector<16x16xf32> to vector<16x16xbf16>
    %c0_26 = arith.constant 0 : index
    %c0_27 = arith.constant 0 : index
    %c0_28 = arith.constant 0 : index
    %61 = vector.load %arg20[%c0_26, %c0_27, %c0_28] : memref<1x32x32xbf16, #tpu.memory_space<vmem>>, vector<1x16x32xbf16>
    %62 = vector.shape_cast %61 : vector<1x16x32xbf16> to vector<16x32xbf16>
    %cst_29 = arith.constant dense<0.000000e+00> : vector<16x32xf32>
    %63 = tpu.matmul %60, %62, %cst_29 {dimension_numbers = #tpu.dot_dimension_numbers<[1], [0], [0], [1], [0, 0, 1, 1], [], []>} : vector<16x16xbf16>, vector<16x32xbf16>, vector<16x32xf32> -> vector<16x32xf32>
    %64 = arith.addf %39, %63 : vector<16x32xf32>
    %65 = vector.extract_strided_slice %37 {offsets = [0, 16], sizes = [16, 16], strides = [1, 1]} : vector<16x96xf32> to vector<16x16xf32>
    %66 = arith.truncf %65 : vector<16x16xf32> to vector<16x16xbf16>
    %67 = vector.extract_strided_slice %37 {offsets = [0, 48], sizes = [16, 16], strides = [1, 1]} : vector<16x96xf32> to vector<16x16xf32>
    %68 = arith.truncf %67 : vector<16x16xf32> to vector<16x16xbf16>
    %69 = vector.extract_strided_slice %37 {offsets = [0, 80], sizes = [16, 16], strides = [1, 1]} : vector<16x96xf32> to vector<16x16xf32>
    %70 = arith.truncf %69 : vector<16x16xf32> to vector<16x16xbf16>
    "tpu.trace_start"() <{level = 10 : i32, message = "qd,kd->qk"}> : () -> ()
    %cst_30 = arith.constant dense<0.000000e+00> : vector<16x16xf32>
    %71 = tpu.matmul %66, %68, %cst_30 {dimension_numbers = #tpu.dot_dimension_numbers<[1], [1], [0], [0], [0, 0, 1, 0], [], []>} : vector<16x16xbf16>, vector<16x16xbf16>, vector<16x16xf32> -> vector<16x16xf32>
    "tpu.trace_stop"() : () -> ()
    %72 = arith.addf %71, %38 : vector<16x16xf32>
    %cst_31 = arith.constant dense<0xFF800000> : vector<16xf32>
    %73 = vector.multi_reduction <maximumf>, %72, %cst_31 [1] : vector<16x16xf32> to vector<16xf32>
    %74 = vector.shape_cast %73 : vector<16xf32> to vector<16x1xf32>
    %75 = vector.broadcast %74 : vector<16x1xf32> to vector<16x16xf32>
    %76 = arith.subf %72, %75 : vector<16x16xf32>
    %77 = math.exp %76 : vector<16x16xf32>
    %cst_32 = arith.constant dense<0.000000e+00> : vector<16xf32>
    %78 = vector.multi_reduction <add>, %77, %cst_32 [1] : vector<16x16xf32> to vector<16xf32>
    %79 = vector.shape_cast %78 : vector<16xf32> to vector<16x1xf32>
    %80 = tpu.reciprocal %79 {approx = true} : vector<16x1xf32> -> vector<16x1xf32>
    %81 = vector.broadcast %80 : vector<16x1xf32> to vector<16x16xf32>
    %82 = arith.mulf %77, %81 : vector<16x16xf32>
    %83 = arith.truncf %82 : vector<16x16xf32> to vector<16x16xbf16>
    %cst_33 = arith.constant dense<0.000000e+00> : vector<16x16xf32>
    %84 = tpu.matmul %83, %70, %cst_33 {dimension_numbers = #tpu.dot_dimension_numbers<[1], [0], [0], [1], [0, 0, 1, 1], [], []>} : vector<16x16xbf16>, vector<16x16xbf16>, vector<16x16xf32> -> vector<16x16xf32>
    %85 = arith.truncf %84 : vector<16x16xf32> to vector<16x16xbf16>
    %c0_34 = arith.constant 0 : index
    %c16 = arith.constant 16 : index
    %c0_35 = arith.constant 0 : index
    %86 = vector.load %arg20[%c0_34, %c16, %c0_35] : memref<1x32x32xbf16, #tpu.memory_space<vmem>>, vector<1x16x32xbf16>
    %87 = vector.shape_cast %86 : vector<1x16x32xbf16> to vector<16x32xbf16>
    %cst_36 = arith.constant dense<0.000000e+00> : vector<16x32xf32>
    %88 = tpu.matmul %85, %87, %cst_36 {dimension_numbers = #tpu.dot_dimension_numbers<[1], [0], [0], [1], [0, 0, 1, 1], [], []>} : vector<16x16xbf16>, vector<16x32xbf16>, vector<16x32xf32> -> vector<16x32xf32>
    %89 = arith.addf %64, %88 : vector<16x32xf32>
    %90 = arith.addf %3, %89 : vector<16x32xf32>
    %c0_37 = arith.constant 0 : index
    %c0_38 = arith.constant 0 : index
    %c0_39 = arith.constant 0 : index
    %91 = vector.load %arg21[%c0_37, %c0_38, %c0_39] : memref<1x1x32xf32, #tpu.memory_space<vmem>>, vector<1x1x32xf32>
    %92 = vector.shape_cast %91 : vector<1x1x32xf32> to vector<1x32xf32>
    %93 = vector.broadcast %92 : vector<1x32xf32> to vector<16x32xf32>
    %94 = arith.addf %90, %93 : vector<16x32xf32>
    %c0_40 = arith.constant 0 : index
    %c0_41 = arith.constant 0 : index
    %c0_42 = arith.constant 0 : index
    %95 = vector.load %arg24[%c0_40, %c0_41, %c0_42] : memref<1x1x32xf32, #tpu.memory_space<vmem>>, vector<1x1x32xf32>
    %96 = vector.shape_cast %95 : vector<1x1x32xf32> to vector<1x32xf32>
    %c0_43 = arith.constant 0 : index
    %c0_44 = arith.constant 0 : index
    %c0_45 = arith.constant 0 : index
    %97 = vector.load %arg25[%c0_43, %c0_44, %c0_45] : memref<1x1x32xf32, #tpu.memory_space<vmem>>, vector<1x1x32xf32>
    %98 = vector.shape_cast %97 : vector<1x1x32xf32> to vector<1x32xf32>
    %cst_46 = arith.constant dense<0.000000e+00> : vector<16xf32>
    %99 = vector.multi_reduction <add>, %94, %cst_46 [1] : vector<16x32xf32> to vector<16xf32>
    %100 = vector.shape_cast %99 : vector<16xf32> to vector<16x1xf32>
    %cst_47 = arith.constant 3.200000e+01 : f32
    %101 = vector.broadcast %cst_47 : f32 to vector<16x1xf32>
    %102 = arith.divf %100, %101 : vector<16x1xf32>
    %103 = vector.broadcast %102 : vector<16x1xf32> to vector<16x32xf32>
    %104 = arith.subf %94, %103 : vector<16x32xf32>
    %105 = arith.mulf %104, %104 : vector<16x32xf32>
    %cst_48 = arith.constant dense<0.000000e+00> : vector<16xf32>
    %106 = vector.multi_reduction <add>, %105, %cst_48 [1] : vector<16x32xf32> to vector<16xf32>
    %107 = vector.shape_cast %106 : vector<16xf32> to vector<16x1xf32>
    %cst_49 = arith.constant 3.200000e+01 : f32
    %108 = vector.broadcast %cst_49 : f32 to vector<16x1xf32>
    %109 = arith.divf %107, %108 : vector<16x1xf32>
    %110 = vector.broadcast %102 : vector<16x1xf32> to vector<16x32xf32>
    %111 = arith.subf %94, %110 : vector<16x32xf32>
    %cst_50 = arith.constant 9.99999974E-6 : f32
    %112 = vector.broadcast %cst_50 : f32 to vector<16x1xf32>
    %113 = arith.addf %109, %112 : vector<16x1xf32>
    %114 = math.rsqrt %113 : vector<16x1xf32>
    %115 = vector.broadcast %114 : vector<16x1xf32> to vector<16x32xf32>
    %116 = arith.mulf %111, %115 : vector<16x32xf32>
    %117 = vector.broadcast %96 : vector<1x32xf32> to vector<16x32xf32>
    %118 = arith.mulf %116, %117 : vector<16x32xf32>
    %119 = vector.broadcast %98 : vector<1x32xf32> to vector<16x32xf32>
    %120 = arith.addf %118, %119 : vector<16x32xf32>
    %121 = arith.truncf %120 : vector<16x32xf32> to vector<16x32xbf16>
    %c0_51 = arith.constant 0 : index
    %c0_52 = arith.constant 0 : index
    %c0_53 = arith.constant 0 : index
    %122 = vector.load %arg26[%c0_51, %c0_52, %c0_53] : memref<1x32x128xbf16, #tpu.memory_space<vmem>>, vector<1x32x128xbf16>
    %123 = vector.shape_cast %122 : vector<1x32x128xbf16> to vector<32x128xbf16>
    %cst_54 = arith.constant dense<0.000000e+00> : vector<16x128xf32>
    %124 = tpu.matmul %121, %123, %cst_54 {dimension_numbers = #tpu.dot_dimension_numbers<[1], [0], [0], [1], [0, 0, 1, 1], [], []>} : vector<16x32xbf16>, vector<32x128xbf16>, vector<16x128xf32> -> vector<16x128xf32>
    %c0_55 = arith.constant 0 : index
    %c0_56 = arith.constant 0 : index
    %c0_57 = arith.constant 0 : index
    %125 = vector.load %arg27[%c0_55, %c0_56, %c0_57] : memref<1x1x128xf32, #tpu.memory_space<vmem>>, vector<1x1x128xf32>
    %126 = vector.shape_cast %125 : vector<1x1x128xf32> to vector<1x128xf32>
    %127 = vector.broadcast %126 : vector<1x128xf32> to vector<16x128xf32>
    %128 = arith.addf %124, %127 : vector<16x128xf32>
    %cst_58 = arith.constant 5.000000e-01 : f32
    %129 = vector.broadcast %cst_58 : f32 to vector<16x128xf32>
    %130 = arith.mulf %129, %128 : vector<16x128xf32>
    %cst_59 = arith.constant 0.707106769 : f32
    %131 = vector.broadcast %cst_59 : f32 to vector<16x128xf32>
    %132 = arith.mulf %128, %131 : vector<16x128xf32>
    %133 = math.erf %132 : vector<16x128xf32>
    %cst_60 = arith.constant 1.000000e+00 : f32
    %134 = vector.broadcast %cst_60 : f32 to vector<16x128xf32>
    %135 = arith.addf %134, %133 : vector<16x128xf32>
    %136 = arith.mulf %130, %135 : vector<16x128xf32>
    %137 = arith.truncf %136 : vector<16x128xf32> to vector<16x128xbf16>
    %c0_61 = arith.constant 0 : index
    %c0_62 = arith.constant 0 : index
    %c0_63 = arith.constant 0 : index
    %138 = vector.load %arg28[%c0_61, %c0_62, %c0_63] : memref<1x128x32xbf16, #tpu.memory_space<vmem>>, vector<1x128x32xbf16>
    %139 = vector.shape_cast %138 : vector<1x128x32xbf16> to vector<128x32xbf16>
    %cst_64 = arith.constant dense<0.000000e+00> : vector<16x32xf32>
    %140 = tpu.matmul %137, %139, %cst_64 {dimension_numbers = #tpu.dot_dimension_numbers<[1], [0], [0], [1], [0, 0, 1, 1], [], []>} : vector<16x128xbf16>, vector<128x32xbf16>, vector<16x32xf32> -> vector<16x32xf32>
    %141 = arith.addf %94, %140 : vector<16x32xf32>
    %c0_65 = arith.constant 0 : index
    %c0_66 = arith.constant 0 : index
    %c0_67 = arith.constant 0 : index
    %142 = vector.load %arg29[%c0_65, %c0_66, %c0_67] : memref<1x1x32xf32, #tpu.memory_space<vmem>>, vector<1x1x32xf32>
    %143 = vector.shape_cast %142 : vector<1x1x32xf32> to vector<1x32xf32>
    %144 = vector.broadcast %143 : vector<1x32xf32> to vector<16x32xf32>
    %145 = arith.addf %141, %144 : vector<16x32xf32>
    %c0_68 = arith.constant 0 : index
    %c0_69 = arith.constant 0 : index
    %146 = vector.load %arg35[%c0_68, %c0_69] : memref<16x32xf32, #tpu.memory_space<vmem>>, vector<16x32xf32>
    tpu.vector_store %arg35[%c0_68, %c0_69], %145 {strides = array<i32>} : memref<16x32xf32, #tpu.memory_space<vmem>>, vector<16x32xf32>,
    %c1_i32 = arith.constant 1 : i32
    %147 = arith.cmpi eq, %arg1, %c1_i32 : i32
    %148 = arith.extui %147 : i1 to i32
    %c0_i32_70 = arith.constant 0 : i32
    %149 = arith.cmpi ne, %148, %c0_i32_70 : i32
    scf.if %149 {
      %150 = vector.extract_strided_slice %145 {offsets = [15, 0], sizes = [1, 32], strides = [1, 1]} : vector<16x32xf32> to vector<1x32xf32>
      %151 = arith.truncf %150 : vector<1x32xf32> to vector<1x32xbf16>
      %c0_71 = arith.constant 0 : index
      %c0_72 = arith.constant 0 : index
      %152 = vector.load %arg30[%c0_71, %c0_72] : memref<32x32xbf16, #tpu.memory_space<vmem>>, vector<32x32xbf16>
      %cst_73 = arith.constant dense<0.000000e+00> : vector<1x32xf32>
      %153 = tpu.matmul %151, %152, %cst_73 {dimension_numbers = #tpu.dot_dimension_numbers<[1], [0], [0], [1], [0, 0, 1, 1], [], []>} : vector<1x32xbf16>, vector<32x32xbf16>, vector<1x32xf32> -> vector<1x32xf32>
      %c0_74 = arith.constant 0 : index
      %c0_75 = arith.constant 0 : index
      %154 = vector.load %arg31[%c0_74, %c0_75] : memref<1x32xf32, #tpu.memory_space<vmem>>, vector<1x32xf32>
      %155 = arith.addf %153, %154 : vector<1x32xf32>
      %cst_76 = arith.constant 5.000000e-01 : f32
      %156 = vector.broadcast %cst_76 : f32 to vector<1x32xf32>
      %157 = arith.mulf %156, %155 : vector<1x32xf32>
      %cst_77 = arith.constant 0.707106769 : f32
      %158 = vector.broadcast %cst_77 : f32 to vector<1x32xf32>
      %159 = arith.mulf %155, %158 : vector<1x32xf32>
      %160 = math.erf %159 : vector<1x32xf32>
      %cst_78 = arith.constant 1.000000e+00 : f32
      %161 = vector.broadcast %cst_78 : f32 to vector<1x32xf32>
      %162 = arith.addf %161, %160 : vector<1x32xf32>
      %163 = arith.mulf %157, %162 : vector<1x32xf32>
      %c0_79 = arith.constant 0 : index
      %c0_80 = arith.constant 0 : index
      %164 = vector.load %arg32[%c0_79, %c0_80] : memref<1x32xf32, #tpu.memory_space<vmem>>, vector<1x32xf32>
      %165 = arith.mulf %163, %164 : vector<1x32xf32>
      %cst_81 = arith.constant dense<0.000000e+00> : vector<1xf32>
      %166 = vector.multi_reduction <add>, %165, %cst_81 [1] : vector<1x32xf32> to vector<1xf32>
      %167 = vector.shape_cast %166 : vector<1xf32> to vector<1x1xf32>
      %c0_82 = arith.constant 0 : index
      %c0_83 = arith.constant 0 : index
      %168 = vector.load %arg33[%c0_82, %c0_83] : memref<1x1xf32, #tpu.memory_space<vmem>>, vector<1x1xf32>
      %169 = arith.addf %167, %168 : vector<1x1xf32>
      %170 = vector.shape_cast %169 : vector<1x1xf32> to vector<1x1xf32>
      %171 = vector.broadcast %170 : vector<1x1xf32> to vector<8x128xf32>
      %c0_84 = arith.constant 0 : index
      %c0_85 = arith.constant 0 : index
      %c0_86 = arith.constant 0 : index
      %172 = vector.load %arg34[%c0_84, %c0_85, %c0_86] : memref<1x8x128xf32, #tpu.memory_space<vmem>>, vector<1x8x128xf32>
      %173 = vector.shape_cast %172 : vector<1x8x128xf32> to vector<8x128xf32>
      %174 = vector.shape_cast %171 : vector<8x128xf32> to vector<1x8x128xf32>
      tpu.vector_store %arg34[%c0_84, %c0_85, %c0_86], %174 {strides = array<i32>} : memref<1x8x128xf32, #tpu.memory_space<vmem>>, vector<1x8x128xf32>,
    } else {
    }
    return
  }
  func.func @transform_0(%arg0: i32, %arg1: i32) -> (i32, i32, i32) {
    %c0_i32 = arith.constant 0 : i32
    %c0_i32_0 = arith.constant 0 : i32
    %c0_i32_1 = arith.constant 0 : i32
    return %arg0, %c0_i32, %c0_i32_0 : i32, i32, i32
  }
  func.func @transform_1(%arg0: i32, %arg1: i32) -> (i32, i32, i32) {
    %c0_i32 = arith.constant 0 : i32
    %c0_i32_0 = arith.constant 0 : i32
    %c0_i32_1 = arith.constant 0 : i32
    return %arg0, %c0_i32, %c0_i32_0 : i32, i32, i32
  }
  func.func @transform_2(%arg0: i32, %arg1: i32) -> (i32, i32, i32) {
    %c0_i32 = arith.constant 0 : i32
    %c0_i32_0 = arith.constant 0 : i32
    %c0_i32_1 = arith.constant 0 : i32
    return %arg0, %c0_i32, %c0_i32_0 : i32, i32, i32
  }
  func.func @transform_3(%arg0: i32, %arg1: i32) -> (i32, i32) {
    %c0_i32 = arith.constant 0 : i32
    %c0_i32_0 = arith.constant 0 : i32
    %c0_i32_1 = arith.constant 0 : i32
    return %c0_i32, %c0_i32_0 : i32, i32
  }
  func.func @transform_4(%arg0: i32, %arg1: i32) -> (i32, i32) {
    %c0_i32 = arith.constant 0 : i32
    %c0_i32_0 = arith.constant 0 : i32
    %c0_i32_1 = arith.constant 0 : i32
    return %c0_i32, %c0_i32_0 : i32, i32
  }
  func.func @transform_5(%arg0: i32, %arg1: i32) -> (i32, i32) {
    %c0_i32 = arith.constant 0 : i32
    %c0_i32_0 = arith.constant 0 : i32
    %c0_i32_1 = arith.constant 0 : i32
    return %c0_i32, %c0_i32_0 : i32, i32
  }
  func.func @transform_6(%arg0: i32, %arg1: i32) -> (i32, i32) {
    %c0_i32 = arith.constant 0 : i32
    %c0_i32_0 = arith.constant 0 : i32
    %c0_i32_1 = arith.constant 0 : i32
    return %c0_i32, %c0_i32_0 : i32, i32
  }
  func.func @transform_7(%arg0: i32, %arg1: i32) -> (i32, i32) {
    %c0_i32 = arith.constant 0 : i32
    %c0_i32_0 = arith.constant 0 : i32
    %c0_i32_1 = arith.constant 0 : i32
    return %c0_i32, %c0_i32_0 : i32, i32
  }
  func.func @transform_8(%arg0: i32, %arg1: i32) -> (i32, i32) {
    %c0_i32 = arith.constant 0 : i32
    %c0_i32_0 = arith.constant 0 : i32
    %c0_i32_1 = arith.constant 0 : i32
    return %c0_i32, %c0_i32_0 : i32, i32
  }
  func.func @transform_9(%arg0: i32, %arg1: i32) -> (i32, i32) {
    %c0_i32 = arith.constant 0 : i32
    %c0_i32_0 = arith.constant 0 : i32
    %c0_i32_1 = arith.constant 0 : i32
    return %c0_i32, %c0_i32_0 : i32, i32
  }
  func.func @transform_10(%arg0: i32, %arg1: i32) -> (i32, i32) {
    %c0_i32 = arith.constant 0 : i32
    %c0_i32_0 = arith.constant 0 : i32
    %c0_i32_1 = arith.constant 0 : i32
    return %c0_i32, %c0_i32_0 : i32, i32
  }
  func.func @transform_11(%arg0: i32, %arg1: i32) -> (i32, i32) {
    %c0_i32 = arith.constant 0 : i32
    %c0_i32_0 = arith.constant 0 : i32
    %c0_i32_1 = arith.constant 0 : i32
    return %c0_i32, %c0_i32_0 : i32, i32
  }
  func.func @transform_12(%arg0: i32, %arg1: i32) -> (i32, i32) {
    %c0_i32 = arith.constant 0 : i32
    %c0_i32_0 = arith.constant 0 : i32
    %c0_i32_1 = arith.constant 0 : i32
    return %c0_i32, %c0_i32_0 : i32, i32
  }
  func.func @transform_13(%arg0: i32, %arg1: i32) -> (i32, i32) {
    %c0_i32 = arith.constant 0 : i32
    %c0_i32_0 = arith.constant 0 : i32
    %c0_i32_1 = arith.constant 0 : i32
    return %c0_i32, %c0_i32_0 : i32, i32
  }
  func.func @transform_14(%arg0: i32, %arg1: i32) -> (i32, i32) {
    %c0_i32 = arith.constant 0 : i32
    %c0_i32_0 = arith.constant 0 : i32
    %c0_i32_1 = arith.constant 0 : i32
    return %c0_i32, %c0_i32_0 : i32, i32
  }
  func.func @transform_15(%arg0: i32, %arg1: i32) -> (i32, i32) {
    %c0_i32 = arith.constant 0 : i32
    %c0_i32_0 = arith.constant 0 : i32
    %c0_i32_1 = arith.constant 0 : i32
    return %c0_i32, %c0_i32_0 : i32, i32
  }
  func.func @transform_16(%arg0: i32, %arg1: i32) -> (i32, i32, i32) {
    %c0_i32 = arith.constant 0 : i32
    %c0_i32_0 = arith.constant 0 : i32
    %c0_i32_1 = arith.constant 0 : i32
    return %arg1, %c0_i32, %c0_i32_0 : i32, i32, i32
  }
  func.func @transform_17(%arg0: i32, %arg1: i32) -> (i32, i32, i32) {
    %c0_i32 = arith.constant 0 : i32
    %c0_i32_0 = arith.constant 0 : i32
    %c0_i32_1 = arith.constant 0 : i32
    return %arg1, %c0_i32, %c0_i32_0 : i32, i32, i32
  }
  func.func @transform_18(%arg0: i32, %arg1: i32) -> (i32, i32, i32) {
    %c0_i32 = arith.constant 0 : i32
    %c0_i32_0 = arith.constant 0 : i32
    %c0_i32_1 = arith.constant 0 : i32
    return %arg1, %c0_i32, %c0_i32_0 : i32, i32, i32
  }
  func.func @transform_19(%arg0: i32, %arg1: i32) -> (i32, i32, i32) {
    %c0_i32 = arith.constant 0 : i32
    %c0_i32_0 = arith.constant 0 : i32
    %c0_i32_1 = arith.constant 0 : i32
    return %arg1, %c0_i32, %c0_i32_0 : i32, i32, i32
  }
  func.func @transform_20(%arg0: i32, %arg1: i32) -> (i32, i32, i32) {
    %c0_i32 = arith.constant 0 : i32
    %c0_i32_0 = arith.constant 0 : i32
    %c0_i32_1 = arith.constant 0 : i32
    return %arg1, %c0_i32, %c0_i32_0 : i32, i32, i32
  }
  func.func @transform_21(%arg0: i32, %arg1: i32) -> (i32, i32, i32) {
    %c0_i32 = arith.constant 0 : i32
    %c0_i32_0 = arith.constant 0 : i32
    %c0_i32_1 = arith.constant 0 : i32
    return %arg1, %c0_i32, %c0_i32_0 : i32, i32, i32
  }
  func.func @transform_22(%arg0: i32, %arg1: i32) -> (i32, i32, i32) {
    %c0_i32 = arith.constant 0 : i32
    %c0_i32_0 = arith.constant 0 : i32
    %c0_i32_1 = arith.constant 0 : i32
    return %arg1, %c0_i32, %c0_i32_0 : i32, i32, i32
  }
  func.func @transform_23(%arg0: i32, %arg1: i32) -> (i32, i32, i32) {
    %c0_i32 = arith.constant 0 : i32
    %c0_i32_0 = arith.constant 0 : i32
    %c0_i32_1 = arith.constant 0 : i32
    return %arg1, %c0_i32, %c0_i32_0 : i32, i32, i32
  }
  func.func @transform_24(%arg0: i32, %arg1: i32) -> (i32, i32, i32) {
    %c0_i32 = arith.constant 0 : i32
    %c0_i32_0 = arith.constant 0 : i32
    %c0_i32_1 = arith.constant 0 : i32
    return %arg1, %c0_i32, %c0_i32_0 : i32, i32, i32
  }
  func.func @transform_25(%arg0: i32, %arg1: i32) -> (i32, i32, i32) {
    %c0_i32 = arith.constant 0 : i32
    %c0_i32_0 = arith.constant 0 : i32
    %c0_i32_1 = arith.constant 0 : i32
    return %arg1, %c0_i32, %c0_i32_0 : i32, i32, i32
  }
  func.func @transform_26(%arg0: i32, %arg1: i32) -> (i32, i32, i32) {
    %c0_i32 = arith.constant 0 : i32
    %c0_i32_0 = arith.constant 0 : i32
    %c0_i32_1 = arith.constant 0 : i32
    return %arg1, %c0_i32, %c0_i32_0 : i32, i32, i32
  }
  func.func @transform_27(%arg0: i32, %arg1: i32) -> (i32, i32, i32) {
    %c0_i32 = arith.constant 0 : i32
    %c0_i32_0 = arith.constant 0 : i32
    %c0_i32_1 = arith.constant 0 : i32
    return %arg1, %c0_i32, %c0_i32_0 : i32, i32, i32
  }
  func.func @transform_28(%arg0: i32, %arg1: i32) -> (i32, i32) {
    %c0_i32 = arith.constant 0 : i32
    %c0_i32_0 = arith.constant 0 : i32
    %c0_i32_1 = arith.constant 0 : i32
    return %c0_i32, %c0_i32_0 : i32, i32
  }
  func.func @transform_29(%arg0: i32, %arg1: i32) -> (i32, i32) {
    %c0_i32 = arith.constant 0 : i32
    %c0_i32_0 = arith.constant 0 : i32
    %c0_i32_1 = arith.constant 0 : i32
    return %c0_i32, %c0_i32_0 : i32, i32
  }
  func.func @transform_30(%arg0: i32, %arg1: i32) -> (i32, i32) {
    %c0_i32 = arith.constant 0 : i32
    %c0_i32_0 = arith.constant 0 : i32
    %c0_i32_1 = arith.constant 0 : i32
    return %c0_i32, %c0_i32_0 : i32, i32
  }
  func.func @transform_31(%arg0: i32, %arg1: i32) -> (i32, i32) {
    %c0_i32 = arith.constant 0 : i32
    %c0_i32_0 = arith.constant 0 : i32
    %c0_i32_1 = arith.constant 0 : i32
    return %c0_i32, %c0_i32_0 : i32, i32
  }
  func.func @transform_32(%arg0: i32, %arg1: i32) -> (i32, i32, i32) {
    %c0_i32 = arith.constant 0 : i32
    %c0_i32_0 = arith.constant 0 : i32
    %c0_i32_1 = arith.constant 0 : i32
    return %arg0, %c0_i32, %c0_i32_0 : i32, i32, i32
  }
}

</mosaic_0001>

<bundles_post_ra>
// kernel: transformer_critic_forward.1
= control target key start
LH: loop header
LB: loop body
LE: loop exit
PB: predicated region body
PF: predicated region fallthrough
CT: control target
= control target key end

     0   :  { %s2986_s6 = smov 1   ;;  %s2987_s10 = smov 2   ;;  %s3462_s0 = inlined_call_operand.smem [shape: u32[33], index: -1, kind: input, shape index: {}] }
   0x1   :  { %s3037_s5 = sld [smem:[%s3462_s0]]   ;;  %s2988_s14 = smov 3  }
   0x2   :  { %s3042_s9 = sld [smem:[%s3462_s0 + %s2986_s6]]   ;;  %s2989_s18 = smov 4  }
   0x3   :  { %s3047_s13 = sld [smem:[%s3462_s0 + %s2987_s10]]   ;;  %s2990_s22 = smov 5  }
   0x4   :  { %s3052_s17 = sld [smem:[%s3462_s0 + %s2988_s14]]   ;;  %s2991_s26 = smov 6  }
   0x5   :  { %s3057_s21 = sld [smem:[%s3462_s0 + %s2989_s18]]   ;;  %s2992_s30 = smov 7  }
   0x6   :  { %s3062_s25 = sld [smem:[%s3462_s0 + %s2990_s22]]   ;;  %s2993_s4 = smov 8  }
   0x7   :  { %3472 = sst [smem:[#allocation4_spill]] %s3037_s5  ;;  %s2994_s10 = smov 9  }
   0x8   :  { %3473 = sst [smem:[#allocation5_spill]] %s3042_s9  ;;  %s2995_s15 = smov 10  }
   0x9   :  { %3474 = sst [smem:[#allocation6_spill]] %s3047_s13  ;;  %s2996_s20 = smov 11  }
   0xa   :  { %3475 = sst [smem:[#allocation7_spill]] %s3052_s17  ;;  %s2998_s1 = smov 13  }
   0xb   :  { %3476 = sst [smem:[#allocation8_spill]] %s3057_s21  ;;  %s2999_s7 = smov 14  }
   0xc   :  { %3477 = sst [smem:[#allocation9_spill]] %s3062_s25  ;;  %s3001_s22 = smov 16  }
   0xd   :  { %s3067_s29 = sld [smem:[%s3462_s0 + %s2991_s26]]   ;;  %s2997_s26 = smov 12  }
   0xe   :  { %s3072_s3 = sld [smem:[%s3462_s0 + %s2992_s30]]   ;;  %s3002_s28 = smov 17  }
   0xf   :  { %s3077_s8 = sld [smem:[%s3462_s0 + %s2993_s4]]   ;;  %s3017_s23 = smov 32  }
  0x10   :  { %s3082_s14 = sld [smem:[%s3462_s0 + %s2994_s10]]   ;;  %s3201_s2 = smov 0  }
  0x11   :  { %s3087_s19 = sld [smem:[%s3462_s0 + %s2995_s15]]   ;;  %s3000_s15 = smov 15  }
  0x12   :  { %s3092_s24 = sld [smem:[%s3462_s0 + %s2996_s20]]   ;;  %s3205_s10 = smov 0  }
  0x13   :  { %3478 = sst [smem:[#allocation10_spill]] %s3067_s29 }
  0x14   :  { %3479 = sst [smem:[#allocation11_spill]] %s3072_s3 }
  0x15   :  { %3480 = sst [smem:[#allocation12_spill]] %s3077_s8 }
  0x16   :  { %3481 = sst [smem:[#allocation13_spill]] %s3082_s14 }
  0x17   :  { %3482 = sst [smem:[#allocation14_spill]] %s3087_s19 }
  0x18   :  { %3483 = sst [smem:[#allocation15_spill]] %s3092_s24 }
  0x19   :  { %s3097_s30 = sld [smem:[%s3462_s0 + %s2997_s26]]  }
  0x1a   :  { %s3102_s6 = sld [smem:[%s3462_s0 + %s2998_s1]]   ;;  %s3199_s1 = smov 0  }
  0x1b   :  { %s3107_s12 = sld [smem:[%s3462_s0 + %s2999_s7]]   ;;  %s3003_s7 = smov 18  }
  0x1c   :  { %s3112_s20 = sld [smem:[%s3462_s0 + %s3000_s15]]   ;;  %s3004_s15 = smov 19  }
  0x1d   :  { %s3117_s27 = sld [smem:[%s3462_s0 + %s3001_s22]]   ;;  %s3005_s22 = smov 20  }
  0x1e   :  { %s3122_s4 = sld [smem:[%s3462_s0 + %s3002_s28]]   ;;  %s3006_s28 = smov 21  }
  0x1f   :  { %3484 = sst [smem:[#allocation16_spill]] %s3097_s30 }
  0x20   :  { %3485 = sst [smem:[#allocation17_spill]] %s3102_s6 }
  0x21   :  { %3486 = sst [smem:[#allocation18_spill]] %s3107_s12 }
  0x22   :  { %3487 = sst [smem:[#allocation19_spill]] %s3112_s20 }
  0x23   :  { %3488 = sst [smem:[#allocation20_spill]] %s3117_s27 }
  0x24   :  { %s3127_s17 = sld [smem:[%s3462_s0 + %s3003_s7]]   ;;  %s3007_s7 = smov 22  }
  0x25   :  { %s3132_s20 = sld [smem:[%s3462_s0 + %s3004_s15]]   ;;  %s3008_s15 = smov 23  }
  0x26   :  { %s3137_s12 = sld [smem:[%s3462_s0 + %s3005_s22]]   ;;  %s3009_s22 = smov 24  }
  0x27   :  { %s3142_s6 = sld [smem:[%s3462_s0 + %s3006_s28]]   ;;  %s3010_s28 = smov 25  }
  0x28   :  { %s3147_s14 = sld [smem:[%s3462_s0 + %s3007_s7]]   ;;  %s3011_s7 = smov 26  }
  0x29   :  { %s3152_s24 = sld [smem:[%s3462_s0 + %s3008_s15]]   ;;  %s3012_s15 = smov 27  }
  0x2a   :  { %s3157_s19 = sld [smem:[%s3462_s0 + %s3009_s22]]   ;;  %s3013_s22 = smov 28  }
  0x2b   :  { %s3162_s3 = sld [smem:[%s3462_s0 + %s3010_s28]]   ;;  %s3014_s28 = smov 29  }
  0x2c   :  { %s3167_s29 = sld [smem:[%s3462_s0 + %s3011_s7]]   ;;  %s3015_s7 = smov 30  }
  0x2d   :  { %s3172_s30 = sld [smem:[%s3462_s0 + %s3012_s15]]   ;;  %s3016_s15 = smov 31  }
  0x2e   :  { %s3177_s8 = sld [smem:[%s3462_s0 + %s3013_s22]]  }
  0x2f   :  { %s3182_s25 = sld [smem:[%s3462_s0 + %s3014_s28]]   ;;  %s3197_s28 = smov 0  }
  0x30   :  { %s3187_s21 = sld [smem:[%s3462_s0 + %s3015_s7]]   ;;  %s3203_s7 = smov 0  }
  0x32   :  { %3489 = sst [smem:[#allocation21_spill]] %s3167_s29 }
  0x33   :  { %s2584_s29 = sld [smem:[%s3462_s0 + %s3016_s15]]  }
  0x34   :  { %3490 = sst [smem:[#allocation22_spill]] %s3177_s8 }
  0x35   :  { %3491 = sst [smem:[#allocation23_spill]] %s3182_s25 }
  0x36   :  { %3492 = sst [smem:[#allocation24_spill]] %s3187_s21 }
  0x37   :  { %s3195_s8 = sld [smem:[%s3462_s0 + %s3017_s23]]  }
  0x39   :  { %v70_v0 = vstv %s2584_s29 }
  0x3a   :  { %71 = vst [vmem:[#allocation3] sm:$0x1] %v70_v0 }
  0x3b LB: > { %3493 = sst [smem:[#allocation25_spill]] %s2968_s28  ;;  %s86_s0 = sadd.s32 1, %s2976_s2  ;;  %s2984_s10 = sphi %s3205_s10, %s77_s10   ;;  %s2980_s7 = sphi %s3203_s7, %s3535_s7   ;;  %s2976_s2 = sphi %s3201_s2, %s3534_s2   ;;  %s2972_s1 = sphi %s3199_s1, %s3533_s1   ;;  %s2968_s28 = sphi %s3197_s28, %s3532_s28  }
  0x3c   : > { %3494 = sst [smem:[#allocation26_spill]] %s2976_s2  ;;  %s89_s29 = sadd.s32 1, %s2980_s7 }
  0x3d   : > { %3495 = sst [smem:[#allocation27_spill]] %s2980_s7  ;;  %p87_p0 = scmp.ge.s32.totalorder %s86_s0, 2 }
  0x3e   : > { %3496 = sst [smem:[#allocation28_spill]] %s2984_s10  ;;  %p2589_p1 = scmp.ge.s32.totalorder %s2984_s10, 1 }
  0x3f   : > { %p1030_p2 = scmp.lt.s32.totalorder %s2984_s10, 5  ;;  %s3537_s0 = smov (%p87_p0, %s86_s0), 0 }
  0x40   : > { %3497 = sst [smem:[#allocation29_spill]] %s3537_s0  ;;  %s3539_s29 = smov (!%p87_p0, %s89_s29), %s2980_s7 }
  0x41   : > { %p1031_p3 = pnand %p2589_p1, %p1030_p2  ;;  %p91_p4 = scmp.ge.s32.totalorder %s3539_s29, 2 }
  0x43   : > { %s3541_s29 = smov (%p91_p4, %s3539_s29), 0  ;;  %1034 = sbr.rel (%p1031_p3) target bundleno = 4565 (0x11d5), region = 148 }
  0x44   : > { %3498 = sst [smem:[#allocation30_spill]] %s3541_s29 }
  0x4a   : > { %p1162_p5 = scmp.lt.s32.totalorder %s2972_s1, 1  ;;  %s3499_s5 = sld [smem:[#allocation4_spill]] }
  0x4b   : > { %s3502_s27 = sld [smem:[#allocation20_spill]]  ;;  %p1174_p6 = scmp.lt.s32.totalorder %s2968_s28, 1 }
  0x4c   : > { %s3543_s1 = smov (!%p1162_p5, %s2972_s1), 1  ;;  %s3503_s18 = sld [smem:[#allocation21_spill]] }
  0x4d   : > { %s3231_s11 = scalar_select %p1174_p6, %s2968_s28, 1 }
  0x4e   : > { %s3233_s15 = sshll.u32 %s3543_s1, 3 }
  0x4f   : > { %s2655_s26 = sshll.u32 %s3231_s11, 4  ;;  %s1189_s2 = scalar_lea.vmem %s3132_s20, %s3231_s11 }
  0x50   : > { %s1165_s16 = scalar_lea.vmem %s3499_s5, %s3233_s15  ;;  %s3248_s7 = scalar_lea.vmem %s3127_s17, %s2655_s26 }
  0x51   : > { %s3243_s29 = scalar_lea.vmem %s3502_s27, %s2655_s26  ;;  %s1192_s1 = scalar_lea.vmem %s3137_s12, %s3231_s11 }
  0x52   : > { %3504 = sst [smem:[#allocation31_spill]] %s3243_s29  ;;  %s1195_s10 = scalar_lea.vmem %s3142_s6, %s3231_s11 }
  0x53   : > { %s1198_s21 = scalar_lea.vmem %s3147_s14, %s3231_s11  ;;  %s1201_s25 = scalar_lea.vmem %s3152_s24, %s3231_s11 }
  0x54   : > { %s3261_s28 = scalar_lea.vmem %s3157_s19, %s2655_s26  ;;  %s1209_s5 = scalar_lea.vmem %s3162_s3, %s3231_s11 }
  0x55   : > { %s2658_s9 = sshll.u32 %s3231_s11, 6  ;;  %s1217_s23 = scalar_lea.vmem %s3172_s30, %s3231_s11 }
  0x56   : > { %s3269_s13 = scalar_lea.vmem %s3503_s18, %s2658_s9  ;;  %s3505_s27 = sld [smem:[#allocation25_spill]] }
  0x5c   : > { %p2602_p7 = scmp.ne.s32.totalorder %s3505_s27, 0 }
  0x5d   : > { %s3506_s29 = sld [smem:[#allocation8_spill]] (!%p2602_p7)  ;;  %s3507_s0 = sld [smem:[#allocation9_spill]] (!%p2602_p7)  ;;  %vm1242_vm0 = vcmask (!%p2602_p7), 1043456   ;;  %v1228_v2 = vld [vmem:[%s1165_s16] sm:$0xff] (!%p2602_p7)  ;;  %v3018_v3 = vmov (!%p2602_p7), 0.0   ;;  %vm3019_vm1 = vmmov (!%p2602_p7), 0  }
  0x5e   : > { %1226 = sbr.rel (%p2602_p7) target bundleno = 1184 (0x4a0), region = 152  ;;  %2697 = vmatprep.subr.bf16.mxu0 (!%p2602_p7), %v3018_v3  ;;  %s3508_s26 = sld [smem:[#allocation6_spill]] (!%p2602_p7)  ;;  %2699 = vmatprep.mubr.msk.bf16.mxu0 (!%p2602_p7), %vm3019_vm1, %v3018_v3  ;;  %v1229_v5 = vpack.c.bf16 (!%p2602_p7), %v1228_v2, %v1228_v2  ;;  %vm1238_vm2 = vcmask (!%p2602_p7), 64512   ;;  %vm1288_vm3 = vcmask (!%p2602_p7), 261120  }
  0x5f   : > { %2703 = vmatprep.subr.bf16.mxu1 (!%p2602_p7), %v3018_v3  ;;  %2707 = vmatprep.mubr.msk.bf16.mxu1 (!%p2602_p7), %vm3019_vm1, %v3018_v3  ;;  %s3510_s27 = sld [smem:[#allocation12_spill]] (!%p2602_p7)  ;;  %s3513_s16 = sld [smem:[#allocation11_spill]] (!%p2602_p7) }
  0x60   : > { %s3514_s18 = sld [smem:[#allocation14_spill]] (!%p2602_p7)  ;;  %s3517_s22 = sld [smem:[#allocation5_spill]] (!%p2602_p7) }
  0x63   : > { %v1230_v1 = vld [vmem:[%s3506_s29] sm:$0xf] (!%p2602_p7)  ;;  %s3511_s29 = sld [smem:[#allocation16_spill]] (!%p2602_p7) }
  0x64   : > { %v1244_v4 = vsel (!%p2602_p7), %vm1242_vm0, %v1230_v1, 0  ;;  %v2603_v6 = vld [vmem:[%s3507_s0] ss:$0 sm:$0xff] (!%p2602_p7)  ;;  %s3509_s9 = scalar_lea.vmem (!%p2602_p7), %s3508_s26, %s3233_s15  ;;  %s3512_s0 = sld [smem:[#allocation10_spill]] (!%p2602_p7) }
  0x65   : > { %2698 = vmatpush3.bf16.msra.mxu0 %v1244_v4  ;;  %v1419_v11 = vld [vmem:[%s3509_s9] sm:$0xff]  ;;  %v2886_v27 = vld [vmem:[%s3510_s27 + $0x8] sm:$0xff]   ;;  %s3515_s26 = sld [smem:[#allocation15_spill]]  ;;  %s3516_s9 = sld [smem:[#allocation13_spill]] }
  0x66   : > { %2711 = vmatprep.subr.bf16.mxu0 %v3018_v3  ;;  %v1422_v14 = vsel %vm1288_vm3, %v1419_v11, 0.0  ;;  %v2884_v25 = vld [vmem:[%s3510_s27] sm:$0xff]  }
  0x67   : > { %2704 = vmatpush3.bf16.msra.mxu1 %v2884_v25  ;;  %v2606_v38 = vld [vmem:[%s3513_s16] ss:$0 sm:$0xff]  ;;  %s3519_s16 = scalar_lea.vmem %s3517_s22, %s3233_s15  ;;  %s3520_s22 = sld [smem:[#allocation18_spill]] }
  0x68   : > { %2700 = vmatmul.mubr.msk.bf16.vlgmr.msra.gmra.mrb[0].mxu0 %vm1238_vm2, %v1229_v5  ;;  %2705 = vmatprep.subr.bf16.mxu1 %v3018_v3  ;;  %v2613_v41 = vld [vmem:[%s3514_s18] ss:$0 sm:$0xff]  ;;  %s3521_s18 = sld [smem:[#allocation19_spill]] }
  0x69   : > { %2715 = vmatprep.mubr.msk.bf16.mxu0 %vm3019_vm1, %v3018_v3  ;;  %v2885_v26 = vld [vmem:[%s3511_s29] sm:$0xff]   ;;  %v2887_v28 = vld [vmem:[%s3511_s29 + $0x8] sm:$0xff]  }
  0x6a   : > { %2712 = vmatpush3.bf16.msra.mxu0 %v2885_v26  ;;  %v2605_v36 = vld [vmem:[%s3512_s0] ss:$0 sm:$0xff]  ;;  %s3518_s0 = sld [smem:[#allocation17_spill]] }
  0x6b   : > { %2713 = vmatprep.subr.bf16.mxu0 %v3018_v3  ;;  %2706 = vmatpush3.bf16.msra.mxu1 %v2886_v27  ;;  %v2614_v44 = vld [vmem:[%s3515_s26] ss:$0 sm:$0xff] }
  0x6c   : > { %v2607_v59 = vld [vmem:[%s3516_s9] ss:$0 sm:$0xff] }
  0x6d   : > { %v1227_v61 = vld [vmem:[%s3519_s16] sm:$0xff] }
  0x6e   : > { %2714 = vmatpush3.bf16.msra.mxu0 %v2887_v28 }
  0x70   : > { %v2615_v1 = vld [vmem:[%s3518_s0] ss:$0 sm:$0xff] }
 0x13b   : > { %v1280_v7 = vpop.f32.mrb[0].mxu0 }
 0x13c   : > { %v1281_v8 = vadd.f32 %v2603_v6, %v1280_v7  ;;  %v2701_v9 = vpop.f32.mrb[1].mxu0 }
 0x13d   : > { %v1283_v10 = vpop.f32.mrb[2].mxu0 }
 0x13e   : > { %v2702_v12 = vpop.f32.mrb[3].mxu0  ;;  %v1289_v13 = vsel %vm1288_vm3, %v1281_v8, 0.0 }
 0x13f   : > { %1290 = vadd.xlane.f32.xlu0 %v1289_v13 }
 0x143   : > { %1423 = vadd.xlane.f32.xlu0 %v1422_v14 }
 0x1cc   : > { %v1291_v15 = vpop.xlane.xlu0 %1290 }
 0x1cd   : > { %v1293_v16 = vmul.f32 0.03125, %v1291_v15 }
 0x1cf   : > { %v1294_v17 = vsub.f32 %v1281_v8, %v1293_v16 }
 0x1d0   : > { %v1424_v18 = vpop.xlane.xlu0 %1423 }
 0x1d1   : > { %v1425_v19 = vmul.f32 0.03125, %v1424_v18  ;;  %v1295_v20 = vmul.f32 %v1294_v17, %v1294_v17 }
 0x1d3   : > { %v1426_v21 = vsub.f32 %v1419_v11, %v1425_v19  ;;  %v1296_v22 = vsel %vm1288_vm3, %v1295_v20, 0.0 }
 0x1d4   : > { %1297 = vadd.xlane.f32.xlu1 %v1296_v22 }
 0x1d5   : > { %v1427_v23 = vmul.f32 %v1426_v21, %v1426_v21 }
 0x1d7   : > { %v1428_v24 = vsel %vm1288_vm3, %v1427_v23, 0.0 }
 0x1d8   : > { %1429 = vadd.xlane.f32.xlu1 %v1428_v24 }
 0x261   : > { %v1298_v29 = vpop.xlane.xlu1 %1297 }
 0x262   : > { %v1299_v30 = vmul.f32 0.03125, %v1298_v29  ;;  %v2611_v29 = vld [vmem:[%s3520_s22] ss:$0 sm:$0xff] }
 0x264   : > { %v1300_v31 = vadd.f32 1e-05, %v1299_v30 }
 0x265   : > { %v1430_v32 = vpop.xlane.xlu1 %1429 }
 0x266   : > { %2888 = vrsqrt.f32 %v1300_v31  ;;  %v1431_v33 = vmul.f32 0.03125, %v1430_v32  ;;  %v2612_v31 = vld [vmem:[%s3521_s18] ss:$0 sm:$0xff] }
 0x268   : > { %v1432_v34 = vadd.f32 1e-05, %v1431_v33 }
 0x26a   : > { %2890 = vrsqrt.f32 %v1432_v34 }
 0x270   : > { %v2889_v35 = vpop.eup %2888 }
 0x271   : > { %v1302_v37 = vmul.f32 %v2889_v35, %v1294_v17 }
 0x273   : > { %v1309_v39 = vmul.f32 %v2605_v36, %v1302_v37 }
 0x274   : > { %v2891_v40 = vpop.eup %2890 }
 0x275   : > { %v1434_v42 = vmul.f32 %v2891_v40, %v1426_v21  ;;  %v1316_v43 = vadd.f32 %v2606_v38, %v1309_v39 }
 0x277   : > { %v1441_v45 = vmul.f32 %v2613_v41, %v1434_v42  ;;  %v1318_v46 = vmul.f32 0.70710677, %v1316_v43  ;;  %v1317_v50 = vmul.f32 0.5, %v1316_v43 }
 0x279   : > { %2892 = verf.f32 %v1318_v46  ;;  %v1448_v47 = vadd.f32 %v2614_v44, %v1441_v45 }
 0x27b   : > { %v1450_v48 = vmul.f32 0.70710677, %v1448_v47  ;;  %v1449_v55 = vmul.f32 0.5, %v1448_v47 }
 0x27d   : > { %2894 = verf.f32 %v1450_v48 }
 0x283   : > { %v2893_v49 = vpop.eup %2892 }
 0x284   : > { %v1320_v51 = vadd.f32 1.0, %v2893_v49 }
 0x286   : > { %v1321_v52 = vmul.f32 %v1320_v51, %v1317_v50 }
 0x287   : > { %v2895_v53 = vpop.eup %2894 }
 0x288   : > { %v1322_v54 = vpack.c.bf16 %v1321_v52, %v1321_v52  ;;  %v1452_v56 = vadd.f32 1.0, %v2895_v53 }
 0x28a   : > { %2708 = vmatmul.mubr.msk.bf16.vlgmr.msra.gmra.mrb[0].mxu1 %vm1288_vm3, %v1322_v54  ;;  %v1453_v57 = vmul.f32 %v1452_v56, %v1449_v55 }
 0x28c   : > { %v1454_v58 = vpack.c.bf16 %v1453_v57, %v1453_v57 }
 0x28e   : > { %2716 = vmatmul.mubr.msk.bf16.vlgmr.msra.gmra.mrb[4].mxu0 %vm1288_vm3, %v1454_v58 }
 0x35d   : > { %v1383_v60 = vpop.f32.mrb[0].mxu1 }
 0x35e   : > { %v1384_v62 = vadd.f32 %v2607_v59, %v1383_v60  ;;  %v2709_v63 = vpop.f32.mrb[1].mxu1 }
 0x35f   : > { %v1386_v0 = vpop.f32.mrb[2].mxu1 }
 0x360   : > { %v2710_v2 = vpop.f32.mrb[3].mxu1  ;;  %v1389_v3 = vadd.f32 %v1384_v62, %v1227_v61 }
 0x361   : > { %v1515_v4 = vpop.f32.mrb[4].mxu0 }
 0x362   : > { %v1516_v5 = vadd.f32 %v2615_v1, %v1515_v4  ;;  %v2717_v6 = vpop.f32.mrb[5].mxu0  ;;  %v1392_v7 = vsel %vm1288_vm3, %v1389_v3, 0.0 }
 0x363   : > { %v1518_v8 = vpop.f32.mrb[6].mxu0  ;;  %1393 = vadd.xlane.f32.xlu0 %v1392_v7 }
 0x364   : > { %v2718_v9 = vpop.f32.mrb[7].mxu0  ;;  %v1521_v10 = vadd.f32 %v1516_v5, %v1227_v61 }
 0x366   : > { %v1522_v11 = vsel %vm1288_vm3, %v1521_v10, 0.0 }
 0x367   : > { %1523 = vadd.xlane.f32.xlu1 %v1522_v11 }
 0x3f0   : > { %v1394_v12 = vpop.xlane.xlu0 %1393 }
 0x3f1   : > { %v1395_v13 = vmul.f32 0.03125, %v1394_v12 }
 0x3f3   : > { %v1396_v14 = vsub.f32 %v1389_v3, %v1395_v13 }
 0x3f4   : > { %v1524_v15 = vpop.xlane.xlu1 %1523 }
 0x3f5   : > { %v1525_v16 = vmul.f32 0.03125, %v1524_v15  ;;  %v1397_v17 = vmul.f32 %v1396_v14, %v1396_v14 }
 0x3f7   : > { %v1526_v18 = vsub.f32 %v1521_v10, %v1525_v16  ;;  %v1398_v19 = vsel %vm1288_vm3, %v1397_v17, 0.0 }
 0x3f8   : > { %1399 = vadd.xlane.f32.xlu0 %v1398_v19 }
 0x3f9   : > { %v1527_v20 = vmul.f32 %v1526_v18, %v1526_v18 }
 0x3fb   : > { %v1528_v21 = vsel %vm1288_vm3, %v1527_v20, 0.0 }
 0x3fc   : > { %1529 = vadd.xlane.f32.xlu1 %v1528_v21 }
 0x485   : > { %v1400_v22 = vpop.xlane.xlu0 %1399 }
 0x486   : > { %v1401_v23 = vmul.f32 0.03125, %v1400_v22 }
 0x488   : > { %v1402_v24 = vadd.f32 1e-05, %v1401_v23 }
 0x489   : > { %v1530_v25 = vpop.xlane.xlu1 %1529 }
 0x48a   : > { %2896 = vrsqrt.f32 %v1402_v24  ;;  %v1531_v26 = vmul.f32 0.03125, %v1530_v25 }
 0x48c   : > { %v1532_v27 = vadd.f32 1e-05, %v1531_v26 }
 0x48e   : > { %2898 = vrsqrt.f32 %v1532_v27 }
 0x494   : > { %v2897_v28 = vpop.eup %2896 }
 0x495   : > { %v1404_v30 = vmul.f32 %v2897_v28, %v1396_v14 }
 0x497   : > { %v1411_v32 = vmul.f32 %v2611_v29, %v1404_v30 }
 0x498   : > { %v2899_v33 = vpop.eup %2898 }
 0x499   : > { %v1418_v34 = vadd.f32 %v2612_v31, %v1411_v32  ;;  %v1534_v35 = vmul.f32 %v2899_v33, %v1526_v18 }
 0x49b   : > { %1537 = vst.msk [vmem:[#allocation2] sm:$0xff] %vm1288_vm3, %v1418_v34  ;;  %v1535_v36 = vmul.f32 %v2611_v29, %v1534_v35 }
 0x49d   : > { %v1536_v37 = vadd.f32 %v2612_v31, %v1535_v36 }
 0x49f   : > { %1538 = vst.msk [vmem:[#allocation2 + $0x8] sm:$0xff] %vm1288_vm3, %v1536_v37 }
 0x4a0 PF: > { %vm1543_vm4 = vcmask 261120   ;;  %s3522_s26 = sld [smem:[#allocation31_spill]]  ;;  %v3020_v53 = vmov 0.0   ;;  %vm3021_vm5 = vmmov 0   ;;  %v2619_v63 = vld [vmem:[%s1192_s1] ss:$0 sm:$0xff]  ;;  %s3523_s9 = scalar_lea.vmem %s3122_s4, %s3231_s11 }
 0x4a1   : > { %2719 = vmatprep.subr.bf16.mxu1 %v3020_v53  ;;  %2745 = vmatprep.subr.bf16.mxu0 %v3020_v53  ;;  %v2620_v3 = vld [vmem:[%s1195_s10] ss:$0 sm:$0xff]  ;;  %s3524_s1 = sld [smem:[#allocation7_spill]]  ;;  %s3022_s10 = smov 96   ;;  %vm1661_vm6 = vcmask 130048  }
 0x4a2   : > { %v3306_v38 = vld [vmem:[#allocation2] sm:$0xff]  ;;  %2723 = vmatprep.mubr.msk.bf16.mxu1 %vm3021_vm5, %v3020_v53  ;;  %2747 = vmatprep.mubr.msk.bf16.mxu0 %vm3021_vm5, %v3020_v53  ;;  %s3023_s16 = smov 80   ;;  %s3024_s22 = smov 112  }
 0x4a3   : > { %v1544_v40 = vsel %vm1543_vm4, %v3306_v38, 0.0  ;;  %v2621_v8 = vld [vmem:[%s3523_s9] ss:$0 sm:$0xff]  ;;  %s3025_s18 = smov 64  }
 0x4a4   : > { %1545 = vadd.xlane.f32.xlu0 %v1544_v40 }
 0x4a6   : > { %v3308_v39 = vld [vmem:[#allocation2 + $0x8] sm:$0xff]  ;;  %v2900_v52 = vld [vmem:[%s3522_s26] sm:$0xff]  }
 0x4a7   : > { %v1547_v41 = vsel %vm1543_vm4, %v3308_v39, 0.0  ;;  %2720 = vmatpush3.bf16.msra.mxu1 %v2900_v52  ;;  %v2901_v54 = vld [vmem:[%s3522_s26 + $0x8] sm:$0xff]   ;;  %s3525_s0 = smov %s3524_s1  ;;  %v1655_v18 = vld [vmem:[%s3524_s1] sm:$0xff]  ;;  %s3026_s26 = smov 48  }
 0x4a8   : > { %1548 = vadd.xlane.f32.xlu0 %v1547_v41  ;;  %2721 = vmatprep.subr.bf16.mxu1 %v3020_v53  ;;  %v1656_v20 = vld [vmem:[%s3525_s0 + $0x8] sm:$0xff] }
 0x4ab   : > { %2722 = vmatpush3.bf16.msra.mxu1 %v2901_v54 }
 0x4ac   : > { %2727 = vmatprep.subr.bf16.mxu1 %v3020_v53 }
 0x531   : > { %v1546_v42 = vpop.xlane.xlu0 %1545 }
 0x532   : > { %v1551_v43 = vmul.f32 0.03125, %v1546_v42 }
 0x534   : > { %v1553_v44 = vsub.f32 %v3306_v38, %v1551_v43 }
 0x535   : > { %v1549_v45 = vpop.xlane.xlu0 %1548 }
 0x536   : > { %v1552_v46 = vmul.f32 0.03125, %v1549_v45  ;;  %v1555_v47 = vmul.f32 %v1553_v44, %v1553_v44 }
 0x538   : > { %v1554_v48 = vsub.f32 %v3308_v39, %v1552_v46  ;;  %v1557_v49 = vsel %vm1543_vm4, %v1555_v47, 0.0 }
 0x539   : > { %1558 = vadd.xlane.f32.xlu1 %v1557_v49 }
 0x53a   : > { %v1556_v50 = vmul.f32 %v1554_v48, %v1554_v48 }
 0x53c   : > { %v1560_v51 = vsel %vm1543_vm4, %v1556_v50, 0.0 }
 0x53d   : > { %1561 = vadd.xlane.f32.xlu1 %v1560_v51 }
 0x5c6   : > { %v1559_v55 = vpop.xlane.xlu1 %1558 }
 0x5c7   : > { %v1563_v56 = vmul.f32 0.03125, %v1559_v55 }
 0x5c9   : > { %v1565_v57 = vadd.f32 1e-05, %v1563_v56 }
 0x5ca   : > { %v1562_v58 = vpop.xlane.xlu1 %1561 }
 0x5cb   : > { %2914 = vrsqrt.f32 %v1565_v57  ;;  %v1564_v59 = vmul.f32 0.03125, %v1562_v58 }
 0x5cd   : > { %v1566_v60 = vadd.f32 1e-05, %v1564_v59 }
 0x5cf   : > { %2916 = vrsqrt.f32 %v1566_v60 }
 0x5d5   : > { %v2915_v61 = vpop.eup %2914 }
 0x5d6   : > { %v1569_v62 = vmul.f32 %v2915_v61, %v1553_v44 }
 0x5d8   : > { %v1577_v2 = vmul.f32 %v2619_v63, %v1569_v62 }
 0x5d9   : > { %v2917_v0 = vpop.eup %2916 }
 0x5da   : > { %v1570_v1 = vmul.f32 %v2917_v0, %v1554_v48  ;;  %v1585_v5 = vadd.f32 %v2620_v3, %v1577_v2 }
 0x5dc   : > { %v1578_v4 = vmul.f32 %v2619_v63, %v1570_v1 }
 0x5de   : > { %v1586_v6 = vadd.f32 %v2620_v3, %v1578_v4 }
 0x5e0   : > { %v1587_v7 = vpack.c.bf16 %v1586_v6, %v1585_v5 }
 0x5e2   : > { %2724 = vmatmul.mubr.msk.bf16.vlgmr.msra.gmra.mrb[0].mxu1 %vm1543_vm4, %v1587_v7 }
 0x5e3   : > { %2729 = vmatprep.mubr.msk.bf16.mxu1 %vm3021_vm5, %v3020_v53 }
 0x6b5   : > { %v1648_v9 = vpop.f32.mrb[0].mxu1 }
 0x6b6   : > { %v2725_v10 = vpop.f32.mrb[1].mxu1  ;;  %v1649_v12 = vadd.f32 %v2621_v8, %v1648_v9 }
 0x6b7   : > { %v1651_v11 = vpop.f32.mrb[2].mxu1 }
 0x6b8   : > { %v1652_v13 = vadd.f32 %v2621_v8, %v1651_v11  ;;  %v2726_v14 = vpop.f32.mrb[3].mxu1  ;;  %v2903_v11 = vld [vmem:[%s3248_s7 + $0x8] sm:$0xff]  }
 0x6ba   : > { %v3340_v15 = vpack.c.bf16 %v1652_v13, %v1649_v12 }
 0x6bc   : > { %1659 = vrot.lane.b32.xlu0 %v3340_v15, %s3022_s10 }
 0x6c0   : > { %1784 = vrot.lane.b32.xlu0 %v3340_v15, %s3023_s16 }
 0x6c4   : > { %1782 = vrot.lane.b32.xlu0 %v3340_v15, %s3024_s22 }
 0x72e   : > { %v1660_v16 = vpop.permute.xlu0 %1659 }
 0x72f   : > { %v1666_v17 = vsel %vm1661_vm6, %v1660_v16, 0 }
 0x730   : > { %2728 = vmatpush3.bf16.xpose.msra.mxu1 %v1666_v17 }
 0x731   : > { %2733 = vmatprep.subr.bf16.mxu1 %v3020_v53 }
 0x732   : > { %v1785_v47 = vpop.permute.xlu0 %1784 }
 0x733   : > { %v1790_v49 = vsel %vm1661_vm6, %v1785_v47, 0 }
 0x736   : > { %v1783_v50 = vpop.permute.xlu0 %1782 }
 0x737   : > { %2730 = vmatmul.mubr.msk.bf16.vlgmr.msra.gmra.mrb[4].mxu1 %vm1661_vm6, %v3340_v15 }
 0x738   : > { %2735 = vmatprep.mubr.msk.bf16.mxu1 %vm3021_vm5, %v3020_v53 }
 0x80a   : > { %v1702_v19 = vpop.f32.mrb[4].mxu1 }
 0x80b   : > { %v1703_v21 = vadd.f32 %v1702_v19, %v1655_v18  ;;  %v2731_v22 = vpop.f32.mrb[5].mxu1 }
 0x80c   : > { %v1705_v23 = vpop.f32.mrb[6].mxu1 }
 0x80d   : > { %v1706_v24 = vadd.f32 %v1705_v23, %v1656_v20  ;;  %v2732_v25 = vpop.f32.mrb[7].mxu1  ;;  %v1709_v26 = vsel %vm1661_vm6, %v1703_v21, -inf }
 0x80e   : > { %1710 = vmax.xlane.f32.xlu1 %v1709_v26 }
 0x80f   : > { %v1712_v27 = vsel %vm1661_vm6, %v1706_v24, -inf }
 0x812   : > { %1713 = vmax.xlane.f32.xlu1 %v1712_v27 }
 0x89b   : > { %v1711_v28 = vpop.xlane.xlu1 %1710 }
 0x89c   : > { %v1715_v29 = vsub.f32 %v1703_v21, %v1711_v28 }
 0x89e   : > { %v1717_v30 = vmul.f32 1.442695, %v1715_v29 }
 0x89f   : > { %v1714_v31 = vpop.xlane.xlu1 %1713 }
 0x8a0   : > { %2918 = vpow2.f32 %v1717_v30  ;;  %v1716_v32 = vsub.f32 %v1706_v24, %v1714_v31 }
 0x8a2   : > { %v1719_v33 = vmul.f32 1.442695, %v1716_v32 }
 0x8a4   : > { %2920 = vpow2.f32 %v1719_v33  ;;  %v2633_v33 = vld [vmem:[%s1189_s2] ss:$0 sm:$0xff] }
 0x8aa   : > { %v2919_v34 = vpop.eup %2918 }
 0x8ab   : > { %v1721_v35 = vsel %vm1661_vm6, %v2919_v34, 0.0 }
 0x8ac   : > { %1722 = vadd.xlane.f32.xlu1 %v1721_v35 }
 0x8ae   : > { %v2921_v36 = vpop.eup %2920 }
 0x8af   : > { %v1724_v37 = vsel %vm1661_vm6, %v2921_v36, 0.0 }
 0x8b0   : > { %1725 = vadd.xlane.f32.xlu1 %v1724_v37 }
 0x8c1   : > { %1732 = vrot.lane.b32.xlu1 %v3340_v15, %s3025_s18 }
 0x939   : > { %v1723_v40 = vpop.xlane.xlu1 %1722 }
 0x93a   : > { %2922 = vrcp.f32 %v1723_v40 }
 0x93d   : > { %v1726_v41 = vpop.xlane.xlu1 %1725 }
 0x93e   : > { %2924 = vrcp.f32 %v1726_v41 }
 0x941   : > { %v1733_v42 = vpop.permute.xlu1 %1732 }
 0x942   : > { %2734 = vmatpush3.bf16.msra.mxu1 %v1733_v42 }
 0x943   : > { %2739 = vmatprep.subr.bf16.mxu1 %v3020_v53 }
 0x944   : > { %v2923_v43 = vpop.eup %2922 }
 0x945   : > { %v1729_v45 = vmul.f32 %v2923_v43, %v2919_v34 }
 0x948   : > { %v2925_v44 = vpop.eup %2924 }
 0x949   : > { %v1730_v46 = vmul.f32 %v2925_v44, %v2921_v36 }
 0x94b   : > { %v1731_v48 = vpack.c.bf16 %v1730_v46, %v1729_v45 }
 0x94d   : > { %2736 = vmatmul.mubr.msk.bf16.vlgmr.msra.gmra.mrb[8].mxu1 %vm1661_vm6, %v1731_v48 }
 0x94e   : > { %2740 = vmatpush3.bf16.xpose.msra.mxu1 %v1790_v49  ;;  %2741 = vmatprep.mubr.msk.bf16.mxu1 %vm3021_vm5, %v3020_v53 }
 0x94f   : > { %2751 = vmatprep.subr.bf16.mxu1 %v3020_v53 }
 0x955   : > { %2742 = vmatmul.mubr.msk.bf16.vlgmr.msra.gmra.mrb[12].mxu1 %vm1661_vm6, %v1783_v50 }
 0x956   : > { %2753 = vmatprep.mubr.msk.bf16.mxu1 %vm3021_vm5, %v3020_v53  ;;  %2752 = vmatpush3.bf16.msra.mxu1 %v2903_v11  ;;  %v2908_v11 = vld [vmem:[%s3269_s13 + $0x10] sm:$0xff]  }
 0x957   : > { %2763 = vmatprep.subr.bf16.mxu1 %v3020_v53 }
 0xa20   : > { %v1772_v51 = vpop.f32.mrb[8].mxu1 }
 0xa21   : > { %v2737_v52 = vpop.f32.mrb[9].mxu1 }
 0xa22   : > { %v1775_v54 = vpop.f32.mrb[10].mxu1 }
 0xa23   : > { %v1779_v55 = vpack.c.bf16 %v1775_v54, %v1772_v51  ;;  %v2738_v56 = vpop.f32.mrb[11].mxu1  ;;  %v2904_v54 = vld [vmem:[%s3261_s28] sm:$0xff]  }
 0xa24   : > { %v2906_v56 = vld [vmem:[%s3269_s13] sm:$0xff]  }
 0xa28   : > { %v1826_v57 = vpop.f32.mrb[12].mxu1 }
 0xa29   : > { %v1827_v58 = vadd.f32 %v1826_v57, %v1655_v18  ;;  %v2743_v59 = vpop.f32.mrb[13].mxu1  ;;  %v2907_v57 = vld [vmem:[%s3269_s13 + $0x8] sm:$0xff]  }
 0xa2a   : > { %v1829_v60 = vpop.f32.mrb[14].mxu1 }
 0xa2b   : > { %v1830_v61 = vadd.f32 %v1829_v60, %v1656_v20  ;;  %v2744_v62 = vpop.f32.mrb[15].mxu1  ;;  %v1833_v63 = vsel %vm1661_vm6, %v1827_v58, -inf  ;;  %v2902_v20 = vld [vmem:[%s3248_s7] sm:$0xff]  }
 0xa2c   : > { %1834 = vmax.xlane.f32.xlu0 %v1833_v63 }
 0xa2d   : > { %v1836_v0 = vsel %vm1661_vm6, %v1830_v61, -inf }
 0xa2e   : > { %1837 = vmax.xlane.f32.xlu1 %v1836_v0 }
 0xab9   : > { %v1835_v1 = vpop.xlane.xlu0 %1834 }
 0xaba   : > { %v1839_v2 = vsub.f32 %v1827_v58, %v1835_v1 }
 0xabb   : > { %v1838_v3 = vpop.xlane.xlu1 %1837 }
 0xabc   : > { %v1841_v4 = vmul.f32 1.442695, %v1839_v2  ;;  %v1840_v5 = vsub.f32 %v1830_v61, %v1838_v3  ;;  %v2634_v2 = vld [vmem:[%s1198_s21] ss:$0 sm:$0xff] }
 0xabe   : > { %2926 = vpow2.f32 %v1841_v4  ;;  %v1843_v6 = vmul.f32 1.442695, %v1840_v5 }
 0xac0   : > { %2928 = vpow2.f32 %v1843_v6  ;;  %v2635_v6 = vld [vmem:[%s1201_s25] ss:$0 sm:$0xff] }
 0xac8   : > { %v2927_v7 = vpop.eup %2926 }
 0xac9   : > { %v1845_v8 = vsel %vm1661_vm6, %v2927_v7, 0.0 }
 0xaca   : > { %v2929_v9 = vpop.eup %2928  ;;  %1846 = vadd.xlane.f32.xlu0 %v1845_v8 }
 0xacb   : > { %v1848_v10 = vsel %vm1661_vm6, %v2929_v9, 0.0 }
 0xace   : > { %1849 = vadd.xlane.f32.xlu0 %v1848_v10 }
 0xae4   : > { %1856 = vrot.lane.b32.xlu0 %v3340_v15, %s3026_s26 }
 0xb57   : > { %v1847_v12 = vpop.xlane.xlu0 %1846 }
 0xb58   : > { %2930 = vrcp.f32 %v1847_v12  ;;  %v2909_v12 = vld [vmem:[%s3269_s13 + $0x18] sm:$0xff]  }
 0xb5b   : > { %v1850_v13 = vpop.xlane.xlu0 %1849 }
 0xb5c   : > { %2932 = vrcp.f32 %v1850_v13  ;;  %v2910_v13 = vld [vmem:[%s3269_s13 + $0x20] sm:$0xff]  }
 0xb5f   : > { %v1857_v14 = vpop.permute.xlu0 %1856 }
 0xb60   : > { %2746 = vmatpush3.bf16.msra.mxu0 %v1857_v14  ;;  %v2911_v14 = vld [vmem:[%s3269_s13 + $0x28] sm:$0xff]  }
 0xb61   : > { %2757 = vmatprep.subr.bf16.mxu0 %v3020_v53 }
 0xb62   : > { %v2931_v16 = vpop.eup %2930 }
 0xb63   : > { %v1853_v18 = vmul.f32 %v2931_v16, %v2927_v7  ;;  %v2912_v16 = vld [vmem:[%s3269_s13 + $0x30] sm:$0xff]  }
 0xb66   : > { %v2933_v17 = vpop.eup %2932 }
 0xb67   : > { %v1854_v19 = vmul.f32 %v2933_v17, %v2929_v9  ;;  %v2913_v17 = vld [vmem:[%s3269_s13 + $0x38] sm:$0xff]  }
 0xb69   : > { %v1855_v21 = vpack.c.bf16 %v1854_v19, %v1853_v18  ;;  %v2636_v18 = vld [vmem:[%s1209_s5] ss:$0 sm:$0xff]  ;;  %s3526_s5 = sld [smem:[#allocation25_spill]] }
 0xb6b   : > { %2748 = vmatmul.mubr.msk.bf16.vlgmr.msra.gmra.mrb[0].mxu0 %vm1661_vm6, %v1855_v21 }
 0xb6c   : > { %2758 = vmatpush3.bf16.msra.mxu0 %v2902_v20  ;;  %2759 = vmatprep.mubr.msk.bf16.mxu0 %vm3021_vm5, %v3020_v53 }
 0xb6d   : > { %2771 = vmatprep.subr.bf16.mxu0 %v3020_v53 }
 0xb6f   : > { %p2649_p8 = scmp.ne.s32.totalorder %s3526_s5, 1 }
 0xb70   : > { %s3527_s13 = sld [smem:[#allocation22_spill]] (!%p2649_p8)  ;;  %s3528_s21 = sld [smem:[#allocation23_spill]] (!%p2649_p8)  ;;  %vm3028_vm7 = vmmov (!%p2649_p8), 0   ;;  %vm2334_vm8 = vcmask (!%p2649_p8), 253952  }
 0xb71   : > { %s3529_s25 = sld [smem:[#allocation24_spill]] (!%p2649_p8)  ;;  %s3530_s2 = scalar_lea.vmem (!%p2649_p8), %s3195_s8, %s3233_s15 }
 0xb73   : > { %2760 = vmatmul.mubr.msk.bf16.vlgmr.msra.gmra.mrb[4].mxu0 %vm1661_vm6, %v1779_v55  ;;  %v2905_v55 = vld [vmem:[%s3261_s28 + $0x8] sm:$0xff]  }
 0xb74   : > { %2787 = vmatprep.mubr.msk.bf16.mxu0 %vm3021_vm5, %v3020_v53  ;;  %2772 = vmatpush3.bf16.msra.mxu0 %v2906_v56 }
 0xb75   : > { %2773 = vmatprep.subr.bf16.mxu0 %v3020_v53 }
 0xb78   : > { %2774 = vmatpush3.bf16.msra.mxu0 %v2907_v57 }
 0xb79   : > { %2775 = vmatprep.subr.bf16.mxu0 %v3020_v53 }
 0xb7c   : > { %2776 = vmatpush3.bf16.msra.mxu0 %v2908_v11 }
 0xb7d   : > { %2777 = vmatprep.subr.bf16.mxu0 %v3020_v53 }
 0xb80   : > { %2778 = vmatpush3.bf16.msra.mxu0 %v2909_v12 }
 0xb81   : > { %2779 = vmatprep.subr.bf16.mxu0 %v3020_v53 }
 0xb84   : > { %2780 = vmatpush3.bf16.msra.mxu0 %v2910_v13 }
 0xb85   : > { %2781 = vmatprep.subr.bf16.mxu0 %v3020_v53 }
 0xb88   : > { %2782 = vmatpush3.bf16.msra.mxu0 %v2911_v14 }
 0xb89   : > { %2783 = vmatprep.subr.bf16.mxu0 %v3020_v53 }
 0xb8c   : > { %2784 = vmatpush3.bf16.msra.mxu0 %v2912_v16 }
 0xb8d   : > { %2785 = vmatprep.subr.bf16.mxu0 %v3020_v53 }
 0xb90   : > { %2786 = vmatpush3.bf16.msra.mxu0 %v2913_v17 }
 0xc3e   : > { %v1896_v15 = vpop.f32.mrb[0].mxu0 }
 0xc3f   : > { %v2749_v22 = vpop.f32.mrb[1].mxu0 }
 0xc40   : > { %v1899_v23 = vpop.f32.mrb[2].mxu0 }
 0xc41   : > { %v1903_v24 = vpack.c.bf16 %v1899_v23, %v1896_v15  ;;  %v2750_v25 = vpop.f32.mrb[3].mxu0 }
 0xc43   : > { %2754 = vmatmul.mubr.msk.bf16.vlgmr.msra.gmra.mrb[16].mxu1 %vm1661_vm6, %v1903_v24 }
 0xc44   : > { %2767 = vmatprep.mubr.msk.bf16.mxu1 %vm3021_vm5, %v3020_v53  ;;  %2764 = vmatpush3.bf16.msra.mxu1 %v2904_v54 }
 0xc45   : > { %2765 = vmatprep.subr.bf16.mxu1 %v3020_v53 }
 0xc46   : > { %v1999_v26 = vpop.f32.mrb[4].mxu0 }
 0xc47   : > { %v2761_v27 = vpop.f32.mrb[5].mxu0 }
 0xc48   : > { %v2002_v28 = vpop.f32.mrb[6].mxu0  ;;  %2766 = vmatpush3.bf16.msra.mxu1 %v2905_v55 }
 0xc49   : > { %v2762_v29 = vpop.f32.mrb[7].mxu0 }
 0xd16   : > { %v1949_v30 = vpop.f32.mrb[16].mxu1 }
 0xd17   : > { %v2000_v31 = vadd.f32 %v1999_v26, %v1949_v30  ;;  %v2755_v32 = vpop.f32.mrb[17].mxu1 }
 0xd18   : > { %v1952_v34 = vpop.f32.mrb[18].mxu1 }
 0xd19   : > { %v2006_v35 = vadd.f32 %v2000_v31, %v3306_v38  ;;  %v2003_v36 = vadd.f32 %v2002_v28, %v1952_v34  ;;  %v2756_v37 = vpop.f32.mrb[19].mxu1 }
 0xd1b   : > { %v3390_v40 = vadd.f32 %v2633_v33, %v2006_v35  ;;  %v2007_v41 = vadd.f32 %v2003_v36, %v3308_v39  ;;  %v2648_v35 = vld [vmem:[%s1217_s23] ss:$0 sm:$0xff] }
 0xd1d   : > { %v3393_v42 = vadd.f32 %v2633_v33, %v2007_v41  ;;  %v2019_v43 = vsel %vm1543_vm4, %v3390_v40, 0.0 }
 0xd1e   : > { %2020 = vadd.xlane.f32.xlu1 %v2019_v43 }
 0xd1f   : > { %v2022_v44 = vsel %vm1543_vm4, %v3393_v42, 0.0 }
 0xd22   : > { %2023 = vadd.xlane.f32.xlu1 %v2022_v44 }
 0xdab   : > { %v2021_v45 = vpop.xlane.xlu1 %2020 }
 0xdac   : > { %v2025_v38 = vmul.f32 0.03125, %v2021_v45 }
 0xdae   : > { %v2027_v46 = vsub.f32 %v3390_v40, %v2025_v38 }
 0xdaf   : > { %v2024_v47 = vpop.xlane.xlu1 %2023 }
 0xdb0   : > { %v2026_v39 = vmul.f32 0.03125, %v2024_v47  ;;  %v2029_v48 = vmul.f32 %v2027_v46, %v2027_v46 }
 0xdb2   : > { %v2028_v49 = vsub.f32 %v3393_v42, %v2026_v39  ;;  %v2031_v50 = vsel %vm1543_vm4, %v2029_v48, 0.0  ;;  %v2943_v39 = vld [vmem:[%s3527_s13 + $0x8] sm:$0xff] (!%p2649_p8)  }
 0xdb3   : > { %2032 = vadd.xlane.f32.xlu1 %v2031_v50 }
 0xdb4   : > { %v2030_v51 = vmul.f32 %v2028_v49, %v2028_v49 }
 0xdb6   : > { %v2034_v52 = vsel %vm1543_vm4, %v2030_v51, 0.0 }
 0xdb7   : > { %2035 = vadd.xlane.f32.xlu1 %v2034_v52 }
 0xe40   : > { %v2033_v58 = vpop.xlane.xlu1 %2032 }
 0xe41   : > { %v2037_v59 = vmul.f32 0.03125, %v2033_v58 }
 0xe43   : > { %v2039_v60 = vadd.f32 1e-05, %v2037_v59 }
 0xe44   : > { %v2036_v61 = vpop.xlane.xlu1 %2035 }
 0xe45   : > { %2934 = vrsqrt.f32 %v2039_v60  ;;  %v2038_v62 = vmul.f32 0.03125, %v2036_v61  ;;  %v2332_v60 = vld [vmem:[%s3529_s25] sm:$0x1] (!%p2649_p8) }
 0xe47   : > { %v2040_v63 = vadd.f32 1e-05, %v2038_v62 }
 0xe49   : > { %2936 = vrsqrt.f32 %v2040_v63 }
 0xe4f   : > { %v2935_v0 = vpop.eup %2934 }
 0xe50   : > { %v2043_v1 = vmul.f32 %v2935_v0, %v2027_v46  ;;  %v2942_v46 = vld [vmem:[%s3527_s13] sm:$0xff] (!%p2649_p8)   ;;  %v2338_v0 = vld [vmem:[#allocation3] sm:$0x1] (!%p2649_p8) }
 0xe52   : > { %v2051_v4 = vmul.f32 %v2634_v2, %v2043_v1 }
 0xe53   : > { %v2937_v3 = vpop.eup %2936 }
 0xe54   : > { %v2044_v5 = vmul.f32 %v2937_v3, %v2028_v49  ;;  %v2059_v8 = vadd.f32 %v2635_v6, %v2051_v4  ;;  %v2267_v49 = vld [vmem:[%s3528_s21] sm:$0x1] (!%p2649_p8) }
 0xe56   : > { %v2052_v7 = vmul.f32 %v2634_v2, %v2044_v5 }
 0xe58   : > { %v2060_v9 = vadd.f32 %v2635_v6, %v2052_v7 }
 0xe5a   : > { %v2061_v10 = vpack.c.bf16 %v2060_v9, %v2059_v8 }
 0xe5c   : > { %2768 = vmatmul.mubr.msk.bf16.vlgmr.msra.gmra.mrb[20].mxu1 %vm1543_vm4, %v2061_v10 }
 0xf2f   : > { %v2122_v19 = vpop.f32.mrb[20].mxu1 }
 0xf30   : > { %v2123_v20 = vadd.f32 %v2636_v18, %v2122_v19  ;;  %v2769_v21 = vpop.f32.mrb[21].mxu1 }
 0xf31   : > { %v2125_v15 = vpop.f32.mrb[22].mxu1 }
 0xf32   : > { %v2131_v22 = vmul.f32 0.70710677, %v2123_v20  ;;  %v2126_v23 = vadd.f32 %v2636_v18, %v2125_v15  ;;  %v2770_v24 = vpop.f32.mrb[23].mxu1  ;;  %v2129_v53 = vmul.f32 0.5, %v2123_v20 }
 0xf34   : > { %2938 = verf.f32 %v2131_v22  ;;  %v2132_v25 = vmul.f32 0.70710677, %v2126_v23  ;;  %v2130_v29 = vmul.f32 0.5, %v2126_v23 }
 0xf36   : > { %2940 = verf.f32 %v2132_v25 }
 0xf3e   : > { %v2939_v26 = vpop.eup %2938 }
 0xf3f   : > { %v2135_v27 = vadd.f32 1.0, %v2939_v26 }
 0xf40   : > { %v2941_v28 = vpop.eup %2940 }
 0xf41   : > { %v2136_v30 = vadd.f32 1.0, %v2941_v28  ;;  %v2137_v31 = vmul.f32 %v2135_v27, %v2129_v53 }
 0xf43   : > { %v2138_v32 = vmul.f32 %v2136_v30, %v2130_v29 }
 0xf45   : > { %v2139_v33 = vpack.c.bf16 %v2138_v32, %v2137_v31 }
 0xf47   : > { %2788 = vmatmul.mubr.bf16.vlgmr.msra.gmra.mrb[8].mxu0 %v2139_v33 }
0x101a   : > { %v2238_v34 = vpop.f32.mrb[8].mxu0 }
0x101b   : > { %v2245_v36 = vadd.f32 %v2238_v34, %v3390_v40  ;;  %v2789_v37 = vpop.f32.mrb[9].mxu0  ;;  %2261 = sbr.rel (%p2649_p8) target bundleno = 4565 (0x11d5), region = 156  ;;  %v3027_v40 = vmov (!%p2649_p8), 0.0  }
0x101c   : > { %v2241_v41 = vpop.f32.mrb[10].mxu0  ;;  %2791 = vmatprep.subr.bf16.mxu0 (!%p2649_p8), %v3027_v40  ;;  %2795 = vmatprep.mubr.msk.bf16.mxu0 (!%p2649_p8), %vm3028_vm7, %v3027_v40 }
0x101d   : > { %v2254_v43 = vadd.f32 %v2648_v35, %v2245_v36  ;;  %v2246_v44 = vadd.f32 %v2241_v41, %v3393_v42  ;;  %v2790_v45 = vpop.f32.mrb[11].mxu0  ;;  %2792 = vmatpush3.bf16.msra.mxu0 (!%p2649_p8), %v2942_v46 }
0x101e   : > { %2793 = vmatprep.subr.bf16.mxu0 (!%p2649_p8), %v3027_v40 }
0x101f   : > { %2256 = vst.msk [vmem:[#allocation2] sm:$0xff] %vm1543_vm4, %v2254_v43  ;;  %v2255_v38 = vadd.f32 %v2648_v35, %v2246_v44 }
0x1021   : > { %2257 = vst.msk [vmem:[#allocation2 + $0x8] sm:$0xff] %vm1543_vm4, %v2255_v38  ;;  %v2262_v47 = vpack.c.bf16 (!%p2649_p8), %v2255_v38, %v2255_v38  ;;  %2794 = vmatpush3.bf16.msra.mxu0 (!%p2649_p8), %v2943_v39 }
0x1023   : > { %v2269_v42 = vshrl.u32 %v2262_v47, 16 }
0x1025   : > { %v2271_v48 = vrot.slane %v2269_v42, 3 }
0x1027   : > { %2796 = vmatmul.mubr.msk.bf16.vlgmr.msra.gmra.mrb[0].mxu0 %vm1543_vm4, %v2271_v48 }
0x10fa   : > { %v2321_v50 = vpop.f32.mrb[0].mxu0 }
0x10fb   : > { %v2322_v51 = vadd.f32 %v2321_v50, %v2267_v49  ;;  %v2797_v52 = vpop.f32.mrb[1].mxu0 }
0x10fc   : > { %v2324_v54 = vpop.f32.mrb[2].mxu0 }
0x10fd   : > { %v2328_v55 = vmul.f32 0.70710677, %v2322_v51  ;;  %v2798_v56 = vpop.f32.mrb[3].mxu0  ;;  %v2327_v58 = vmul.f32 0.5, %v2322_v51 }
0x10ff   : > { %2944 = verf.f32 %v2328_v55 }
0x1109   : > { %v2945_v57 = vpop.eup %2944 }
0x110a   : > { %v2330_v59 = vadd.f32 1.0, %v2945_v57 }
0x110c   : > { %v2331_v61 = vmul.f32 %v2330_v59, %v2327_v58 }
0x110e   : > { %v2333_v62 = vmul.f32 %v2332_v60, %v2331_v61 }
0x1110   : > { %v2335_v63 = vsel %vm2334_vm8, %v2333_v62, 0.0 }
0x1111   : > { %2336 = vadd.xlane.f32.xlu0 %v2335_v63 }
0x119e   : > { %v2337_v1 = vpop.xlane.xlu0 %2336 }
0x119f   : > { %v2339_v2 = vadd.f32 %v2338_v0, %v2337_v1 }
0x11a1   : > { %2799 = vpush %v2339_v2 }
0x11d2   : > { %s2800_s28 = spop %2799 }
0x11d3   : > { %v2342_v3 = vstv %s2800_s28 }
0x11d4   : > { %2344 = vst [vmem:[%s3530_s2] sm:$0xff] %v2342_v3 }
0x11d5 PF: > { %s3531_s7 = sld [smem:[#allocation28_spill]]  ;;  %s3532_s28 = sld [smem:[#allocation26_spill]] }
0x11d6   : > { %s3533_s1 = sld [smem:[#allocation27_spill]]  ;;  %s3534_s2 = sld [smem:[#allocation29_spill]] }
0x11db   : > { %s77_s10 = sadd.s32 1, %s3531_s7   ;;  %s3535_s7 = sld [smem:[#allocation30_spill]] }
0x11dc   : > { %p74_p9 = scmp.ge.s32.totalorder %s77_s10, 6  }
0x11de   :  { %76 = sbr.rel (!%p74_p9) target bundleno = 59 (0x3b), region = 260 }

</bundles_post_ra>
